<compile_context>
chip_gen: v7x
topology: tpu7x:2x2x1
jax: 0.10.0
libtpu: 0.0.40
codegen_flags: <defaults>
</compile_context>

<pallas_src>
import numpy as np
import jax
import jax.numpy as jnp
from jax import lax
from jax.experimental import pallas as pl
from jax.experimental.pallas import tpu as pltpu

LEAKY_SLOPE = 0.01  # nn.LeakyReLU default


# ------------------------- parameter construction (glue) -------------------------
def weight_norm_eff(v, g):
    """Effective weight of torch weight_norm (dim=0): w = g * v / ||v||_(per out channel)."""
    flat = v.reshape(v.shape[0], -1)
    norms = np.sqrt((flat ** 2).sum(axis=1))
    scale = (g / norms).reshape((-1,) + (1,) * (v.ndim - 1))
    return (v * scale).astype(np.float32)


def conv2_tap_mats(w2, n_grps):
    """Grouped 3x3 weights (C2, C2//n_grps, 3, 3) -> 9 per-tap (C2_in, C2_out) block-diag mats."""
    C2, in_per_grp = w2.shape[0], w2.shape[1]
    out_per_grp = C2 // n_grps
    taps = np.zeros((9, C2, C2), dtype=np.float32)
    for o in range(C2):
        g = o // out_per_grp
        for ky in range(3):
            for kx in range(3):
                taps[ky * 3 + kx, g * in_per_grp:(g + 1) * in_per_grp, o] = w2[o, :, ky, kx]
    # NOTE: block-diagonal expansion inflates weight bytes / MXU FLOPs by n_grps; acceptable
    # while the kernel is overhead-bound at C2=128, revisit before scaling channels.
    return taps


def build_resblock_params(ch, total_res_blocks, seed=0):
    # The torch module's post-weight_norm init hacks act on the derived .weight tensor and
    # weight_norm renormalizes anyway; the forward only needs *some* weight-normed weights,
    # generated and folded here.
    del total_res_blocks
    rng = np.random.RandomState(seed)
    C, C2 = ch, 2 * ch
    grp_size = 16
    n_grps = C2 // grp_size
    in_per_grp = C2 // n_grps

    v1 = rng.normal(0.0, 0.1, (C2, C)).astype(np.float32)
    g1 = rng.uniform(0.5, 1.5, (C2,)).astype(np.float32)
    b1 = rng.uniform(-0.1, 0.1, (C2,)).astype(np.float32)
    w1 = weight_norm_eff(v1, g1)                       # (C2, C)

    v2 = rng.normal(0.0, 0.1, (C2, in_per_grp, 3, 3)).astype(np.float32)
    g2 = rng.uniform(0.5, 1.5, (C2,)).astype(np.float32)
    b2 = rng.uniform(-0.1, 0.1, (C2,)).astype(np.float32)
    w2 = weight_norm_eff(v2, g2)                       # (C2, in_per_grp, 3, 3)

    v3 = rng.normal(0.0, 0.1, (C, C2)).astype(np.float32)
    g3 = rng.uniform(0.5, 1.5, (C,)).astype(np.float32)
    w3 = weight_norm_eff(v3, g3)                       # (C, C2)

    taps = conv2_tap_mats(w2, n_grps)                  # (9, C2, C2)

    return dict(
        ch=ch, n_grps=n_grps,
        # f32 copies for the pure-JAX reference
        w1=jnp.asarray(w1), b1=jnp.asarray(b1),
        w2=jnp.asarray(w2), b2=jnp.asarray(b2), w3=jnp.asarray(w3),
        # kernel operands: device-resident once, bf16 matmul weights, f32 biases
        w1_k=jnp.asarray(w1.T, dtype=jnp.bfloat16),                        # (C, C2)
        b1_k=jnp.asarray(b1[None, :], dtype=jnp.float32),                  # (1, C2)
        w2p_k=jnp.asarray(taps.reshape(9 * C2, C2), dtype=jnp.bfloat16),   # (9*C2, C2) packed-K
        b2_k=jnp.asarray(b2[None, :], dtype=jnp.float32),                  # (1, C2)
        w3_k=jnp.asarray(w3.T, dtype=jnp.bfloat16),                        # (C2, C)
    )


# ------------------------------- Pallas kernel ------------------------------------
def _pick_tile_rows(H, W, C2, vmem_budget_bytes=8 * 1024 * 1024):
    """Largest row-tile whose packed-tap scratch (rows*9*C2*2 B, the dominant VMEM term)
    stays under the budget; keeps total well inside the default scoped VMEM on v5e/v6e
    and inside v7x's halved (64 MiB physical / 32 MiB scoped) budget."""
    best = None
    for th in range(1, H + 1):
        if H % th:
            continue
        rows = th * W
        if rows % 8:
            continue
        if rows * 9 * C2 * 2 > vmem_budget_bytes:
            continue
        best = th
    return best if best is not None else H


def _make_kernel(W, TH, C2):
    THW = TH * W

    def kernel(x_ref, xu_ref, xd_ref, w1_ref, b1_ref, w2_ref, b2_ref, w3_ref,
               o_ref, h1e_ref, pk_ref):
        t_idx = pl.program_id(1)
        last = pl.num_programs(1) - 1

        def conv1(xin):  # (rows, C) f32 -> (rows, C2) f32, 1x1 conv + bias + LeakyReLU
            h = jnp.dot(xin.astype(jnp.bfloat16), w1_ref[...],
                        preferred_element_type=jnp.float32) + b1_ref[...]
            return jnp.where(h >= 0, h, LEAKY_SLOPE * h)

        # ---- conv1 on the tile rows and the 1-row halos; halo zeroed at image border ----
        h1e_ref[pl.ds(W, THW), :] = conv1(x_ref[0])

        @pl.when(t_idx > 0)
        def _():
            h1e_ref[pl.ds(0, W), :] = conv1(xu_ref[0])

        @pl.when(t_idx == 0)
        def _():
            h1e_ref[pl.ds(0, W), :] = jnp.zeros((W, C2), jnp.float32)

        @pl.when(t_idx < last)
        def _():
            h1e_ref[pl.ds((TH + 1) * W, W), :] = conv1(xd_ref[0])

        @pl.when(t_idx == last)
        def _():
            h1e_ref[pl.ds((TH + 1) * W, W), :] = jnp.zeros((W, C2), jnp.float32)

        # ---- grouped 3x3 conv (padding=1): pack the 9 shifted tap operands (bf16,
        #      masked AFTER the cast) lane-concatenated into scratch, then ONE long-K
        #      matmul so the MXU accumulates internally (no f32 VPU adds, no 9 MRF pops).
        xcol = lax.broadcasted_iota(jnp.int32, (THW, 1), 0) % W
        right_ok = xcol < (W - 1)
        left_ok = xcol > 0
        zero_bf16 = jnp.zeros((), jnp.bfloat16)

        for dy in (-1, 0, 1):
            src = h1e_ref[pl.ds((dy + 1) * W, THW), :]     # (THW, C2) f32, live for 3 taps
            for dx in (-1, 0, 1):
                tap = (dy + 1) * 3 + (dx + 1)
                if dx == 0:
                    a = src.astype(jnp.bfloat16)
                elif dx == 1:
                    a = pltpu.roll(src, THW - 1, axis=0).astype(jnp.bfloat16)
                    a = jnp.where(right_ok, a, zero_bf16)
                else:
                    a = pltpu.roll(src, 1, axis=0).astype(jnp.bfloat16)
                    a = jnp.where(left_ok, a, zero_bf16)
                pk_ref[:, pl.ds(tap * C2, C2)] = a

        h2 = jnp.dot(pk_ref[...], w2_ref[...], preferred_element_type=jnp.float32)
        h2 = h2 + b2_ref[...]
        h2 = jnp.where(h2 >= 0, h2, LEAKY_SLOPE * h2)

        # ---- conv3: 1x1, no bias, + residual (re-read from ref: short live range) ----
        h3 = jnp.dot(h2.astype(jnp.bfloat16), w3_ref[...],
                     preferred_element_type=jnp.float32)
        o_ref[0] = h3 + x_ref[0]

    return kernel


def resblock_pallas(x_slab, w1, b1, w2p, b2, w3, H, W, tile_rows=None):
    """x_slab: (N, H*W, C) f32. Fused conv1(1x1)+leaky -> grouped conv2(3x3)+leaky
    -> conv3(1x1) -> + residual. Grid = (batch, row tiles)."""
    N, HW, C = x_slab.shape
    C2 = w1.shape[1]
    assert HW == H * W

    TH = _pick_tile_rows(H, W, C2) if tile_rows is None else tile_rows
    assert H % TH == 0 and (TH * W) % 8 == 0, (H, W, TH)
    THW = TH * W
    n_tiles = H // TH

    kernel = _make_kernel(W, TH, C2)

    tile_map = lambda n, t: (n, t, 0)
    up_map = lambda n, t: (n, jnp.maximum(t * TH - 1, 0), 0)        # row above tile (clamped)
    dn_map = lambda n, t: (n, jnp.minimum((t + 1) * TH, H - 1), 0)  # row below tile (clamped)
    const = lambda n, t: (0, 0)
    # NOTE: the weight specs are grid-invariant (DMA'd once); at larger C2 they should be
    # single-buffered (or staged once into scratch) to avoid a redundant VMEM copy.

    return pl.pallas_call(
        kernel,
        out_shape=jax.ShapeDtypeStruct((N, HW, C), jnp.float32),
        grid_spec=pltpu.PrefetchScalarGridSpec(
            num_scalar_prefetch=0,
            grid=(N, n_tiles),
            in_specs=[
                pl.BlockSpec((1, THW, C), tile_map),      # x tile (conv1 input + residual)
                pl.BlockSpec((1, W, C), up_map),          # x halo row above
                pl.BlockSpec((1, W, C), dn_map),          # x halo row below
                pl.BlockSpec((C, C2), const),             # w1
                pl.BlockSpec((1, C2), const),             # b1
                pl.BlockSpec((9 * C2, C2), const),        # packed 3x3 tap weights
                pl.BlockSpec((1, C2), const),             # b2
                pl.BlockSpec((C2, C), const),             # w3
            ],
            out_specs=pl.BlockSpec((1, THW, C), tile_map),
            scratch_shapes=[
                pltpu.VMEM(((TH + 2) * W, C2), jnp.float32),   # h1 (tile + 1-row halos)
                pltpu.VMEM((THW, 9 * C2), jnp.bfloat16),       # packed tap operands
            ],
        ),
        compiler_params=pltpu.CompilerParams(
            dimension_semantics=("parallel", "parallel"),   # both axes independent -> megacore
        ),
    )(x_slab, x_slab, x_slab, w1, b1, w2p, b2, w3)


def resblock_forward_pallas(x_nchw, params, tile_rows=None):
    """ResBlock.forward (inference path). Input/output NCHW to match PyTorch."""
    # TODO(synk): torch.utils.checkpoint in the training branch is rematerialization only;
    # forward math is identical, so the inference path is what is implemented.
    N, C, H, W = x_nchw.shape
    x_slab = jnp.transpose(x_nchw, (0, 2, 3, 1)).reshape(N, H * W, C)
    y = resblock_pallas(x_slab, params['w1_k'], params['b1_k'], params['w2p_k'],
                        params['b2_k'], params['w3_k'], H, W, tile_rows=tile_rows)
    # For stacks of ResBlocks, keep the slab layout between blocks to skip these transposes.
    return jnp.transpose(y.reshape(N, H, W, C), (0, 3, 1, 2))


# ----------------- pure-JAX reference (f32 HIGHEST) for verification -----------------
def _leaky(x):
    return jnp.where(x >= 0, x, LEAKY_SLOPE * x)


def resblock_forward_ref(x, params):
    prec = lax.Precision.HIGHEST
    h = jnp.einsum('oi,nihw->nohw', params['w1'], x, precision=prec)
    h = h + params['b1'][None, :, None, None]
    h = _leaky(h)
    h = lax.conv_general_dilated(h, params['w2'], (1, 1), ((1, 1), (1, 1)),
                                 dimension_numbers=('NCHW', 'OIHW', 'NCHW'),
                                 feature_group_count=params['n_grps'],
                                 precision=prec)
    h = h + params['b2'][None, :, None, None]
    h = _leaky(h)
    h = jnp.einsum('oi,nihw->nohw', params['w3'], h, precision=prec)
    return h + x


# ---------------------------------------------------------------------------
if __name__ == "__main__":
    N, CH = 2, 64           # 2*CH must be divisible by grp_size=16 (module constraint)
    H = W = 16
    TOTAL_RES_BLOCKS = 4

    params = build_resblock_params(CH, TOTAL_RES_BLOCKS, seed=0)

    key = jax.random.PRNGKey(0)
    x = jax.random.normal(key, (N, CH, H, W), dtype=jnp.float32)

    # tile_rows=4 -> grid (2, 4): exercises the row-tile halo path and gives the
    # pipeline / megacore several steps even at this tiny spatial size.
    fwd = jax.jit(lambda xx: resblock_forward_pallas(xx, params, tile_rows=4))
    out = jax.block_until_ready(fwd(x))

    ref = jax.block_until_ready(resblock_forward_ref(x, params))

    assert out.shape == (N, CH, H, W), out.shape
    # kernel uses bf16 matmul operands (f32 accumulation) vs f32-HIGHEST reference
    np.testing.assert_allclose(np.asarray(out), np.asarray(ref), rtol=5e-2, atol=5e-2)
    print("KERNEL_OK")
</pallas_src>

<mosaic_0001>
module attributes {stable_mosaic.version = 11 : i64} {
  func.func @kernel(%arg0: i32, %arg1: i32, %arg2: memref<1x64x64xf32, #tpu.memory_space<vmem>>, %arg3: memref<1x16x64xf32, #tpu.memory_space<vmem>>, %arg4: memref<1x16x64xf32, #tpu.memory_space<vmem>>, %arg5: memref<64x128xbf16, #tpu.memory_space<vmem>>, %arg6: memref<1x128xf32, #tpu.memory_space<vmem>>, %arg7: memref<1152x128xbf16, #tpu.memory_space<vmem>>, %arg8: memref<1x128xf32, #tpu.memory_space<vmem>>, %arg9: memref<128x64xbf16, #tpu.memory_space<vmem>>, %arg10: memref<1x64x64xf32, #tpu.memory_space<vmem>>, %arg11: memref<96x128xf32, #tpu.memory_space<vmem>>, %arg12: memref<64x1152xbf16, #tpu.memory_space<vmem>>) attributes {dimension_semantics = [#tpu.dimension_semantics<parallel>, #tpu.dimension_semantics<parallel>], iteration_bounds = array<i64: 2, 4>, scalar_prefetch = 0 : i64, scratch_operands = 2 : i64, tpu.core_type = #tpu.core_type<tc>, window_params = [{transform_indices = @transform_0, window_bounds = array<i64: 1, 64, 64>}, {transform_indices = @transform_1, window_bounds = array<i64: 1, 16, 64>}, {transform_indices = @transform_2, window_bounds = array<i64: 1, 16, 64>}, {pipeline_mode = #tpu.pipeline_mode<synchronous>, transform_indices = @transform_3, window_bounds = array<i64: 64, 128>}, {pipeline_mode = #tpu.pipeline_mode<synchronous>, transform_indices = @transform_4, window_bounds = array<i64: 1, 128>}, {pipeline_mode = #tpu.pipeline_mode<synchronous>, transform_indices = @transform_5, window_bounds = array<i64: 1152, 128>}, {pipeline_mode = #tpu.pipeline_mode<synchronous>, transform_indices = @transform_6, window_bounds = array<i64: 1, 128>}, {pipeline_mode = #tpu.pipeline_mode<synchronous>, transform_indices = @transform_7, window_bounds = array<i64: 128, 64>}, {transform_indices = @transform_8, window_bounds = array<i64: 1, 64, 64>}]} {
    %c0 = arith.constant 0 : index
    %c0_0 = arith.constant 0 : index
    %c0_1 = arith.constant 0 : index
    %0 = vector.load %arg2[%c0, %c0_0, %c0_1] : memref<1x64x64xf32, #tpu.memory_space<vmem>>, vector<1x64x64xf32>
    %1 = vector.shape_cast %0 : vector<1x64x64xf32> to vector<64x64xf32>
    %2 = arith.truncf %1 : vector<64x64xf32> to vector<64x64xbf16>
    %c0_2 = arith.constant 0 : index
    %c0_3 = arith.constant 0 : index
    %3 = vector.load %arg5[%c0_2, %c0_3] : memref<64x128xbf16, #tpu.memory_space<vmem>>, vector<64x128xbf16>
    %cst = arith.constant dense<0.000000e+00> : vector<64x128xf32>
    %4 = tpu.matmul %2, %3, %cst {dimension_numbers = #tpu.dot_dimension_numbers<[1], [0], [0], [1], [0, 0, 1, 1], [], []>} : vector<64x64xbf16>, vector<64x128xbf16>, vector<64x128xf32> -> vector<64x128xf32>
    %c0_4 = arith.constant 0 : index
    %c0_5 = arith.constant 0 : index
    %5 = vector.load %arg6[%c0_4, %c0_5] : memref<1x128xf32, #tpu.memory_space<vmem>>, vector<1x128xf32>
    %6 = vector.broadcast %5 : vector<1x128xf32> to vector<64x128xf32>
    %7 = arith.addf %4, %6 : vector<64x128xf32>
    %cst_6 = arith.constant 0.000000e+00 : f32
    %8 = vector.broadcast %cst_6 : f32 to vector<64x128xf32>
    %9 = arith.cmpf oge, %7, %8 : vector<64x128xf32>
    %cst_7 = arith.constant 0.00999999977 : f32
    %10 = vector.broadcast %cst_7 : f32 to vector<64x128xf32>
    %11 = arith.mulf %10, %7 : vector<64x128xf32>
    %12 = arith.select %9, %7, %11 : vector<64x128xi1>, vector<64x128xf32>
    %c16 = arith.constant 16 : index
    %c0_8 = arith.constant 0 : index
    %13 = vector.load %arg11[%c16, %c0_8] : memref<96x128xf32, #tpu.memory_space<vmem>>, vector<64x128xf32>
    tpu.vector_store %arg11[%c16, %c0_8], %12 {strides = array<i32>} : memref<96x128xf32, #tpu.memory_space<vmem>>, vector<64x128xf32>,
    %c0_i32 = arith.constant 0 : i32
    %14 = arith.cmpi sgt, %arg1, %c0_i32 : i32
    %15 = arith.extui %14 : i1 to i32
    %c0_i32_9 = arith.constant 0 : i32
    %16 = arith.cmpi ne, %15, %c0_i32_9 : i32
    scf.if %16 {
      %c0_64 = arith.constant 0 : index
      %c0_65 = arith.constant 0 : index
      %c0_66 = arith.constant 0 : index
      %118 = vector.load %arg3[%c0_64, %c0_65, %c0_66] : memref<1x16x64xf32, #tpu.memory_space<vmem>>, vector<1x16x64xf32>
      %119 = vector.shape_cast %118 : vector<1x16x64xf32> to vector<16x64xf32>
      %120 = arith.truncf %119 : vector<16x64xf32> to vector<16x64xbf16>
      %c0_67 = arith.constant 0 : index
      %c0_68 = arith.constant 0 : index
      %121 = vector.load %arg5[%c0_67, %c0_68] : memref<64x128xbf16, #tpu.memory_space<vmem>>, vector<64x128xbf16>
      %cst_69 = arith.constant dense<0.000000e+00> : vector<16x128xf32>
      %122 = tpu.matmul %120, %121, %cst_69 {dimension_numbers = #tpu.dot_dimension_numbers<[1], [0], [0], [1], [0, 0, 1, 1], [], []>} : vector<16x64xbf16>, vector<64x128xbf16>, vector<16x128xf32> -> vector<16x128xf32>
      %c0_70 = arith.constant 0 : index
      %c0_71 = arith.constant 0 : index
      %123 = vector.load %arg6[%c0_70, %c0_71] : memref<1x128xf32, #tpu.memory_space<vmem>>, vector<1x128xf32>
      %124 = vector.broadcast %123 : vector<1x128xf32> to vector<16x128xf32>
      %125 = arith.addf %122, %124 : vector<16x128xf32>
      %cst_72 = arith.constant 0.000000e+00 : f32
      %126 = vector.broadcast %cst_72 : f32 to vector<16x128xf32>
      %127 = arith.cmpf oge, %125, %126 : vector<16x128xf32>
      %cst_73 = arith.constant 0.00999999977 : f32
      %128 = vector.broadcast %cst_73 : f32 to vector<16x128xf32>
      %129 = arith.mulf %128, %125 : vector<16x128xf32>
      %130 = arith.select %127, %125, %129 : vector<16x128xi1>, vector<16x128xf32>
      %c0_74 = arith.constant 0 : index
      %c0_75 = arith.constant 0 : index
      %131 = vector.load %arg11[%c0_74, %c0_75] : memref<96x128xf32, #tpu.memory_space<vmem>>, vector<16x128xf32>
      tpu.vector_store %arg11[%c0_74, %c0_75], %130 {strides = array<i32>} : memref<96x128xf32, #tpu.memory_space<vmem>>, vector<16x128xf32>,
    } else {
    }
    %c0_i32_10 = arith.constant 0 : i32
    %17 = arith.cmpi eq, %arg1, %c0_i32_10 : i32
    %18 = arith.extui %17 : i1 to i32
    %c0_i32_11 = arith.constant 0 : i32
    %19 = arith.cmpi ne, %18, %c0_i32_11 : i32
    scf.if %19 {
      %cst_64 = arith.constant 0.000000e+00 : f32
      %118 = vector.broadcast %cst_64 : f32 to vector<16x128xf32>
      %c0_65 = arith.constant 0 : index
      %c0_66 = arith.constant 0 : index
      %119 = vector.load %arg11[%c0_65, %c0_66] : memref<96x128xf32, #tpu.memory_space<vmem>>, vector<16x128xf32>
      tpu.vector_store %arg11[%c0_65, %c0_66], %118 {strides = array<i32>} : memref<96x128xf32, #tpu.memory_space<vmem>>, vector<16x128xf32>,
    } else {
    }
    %c3_i32 = arith.constant 3 : i32
    %20 = arith.cmpi slt, %arg1, %c3_i32 : i32
    %21 = arith.extui %20 : i1 to i32
    %c0_i32_12 = arith.constant 0 : i32
    %22 = arith.cmpi ne, %21, %c0_i32_12 : i32
    scf.if %22 {
      %c0_64 = arith.constant 0 : index
      %c0_65 = arith.constant 0 : index
      %c0_66 = arith.constant 0 : index
      %118 = vector.load %arg4[%c0_64, %c0_65, %c0_66] : memref<1x16x64xf32, #tpu.memory_space<vmem>>, vector<1x16x64xf32>
      %119 = vector.shape_cast %118 : vector<1x16x64xf32> to vector<16x64xf32>
      %120 = arith.truncf %119 : vector<16x64xf32> to vector<16x64xbf16>
      %c0_67 = arith.constant 0 : index
      %c0_68 = arith.constant 0 : index
      %121 = vector.load %arg5[%c0_67, %c0_68] : memref<64x128xbf16, #tpu.memory_space<vmem>>, vector<64x128xbf16>
      %cst_69 = arith.constant dense<0.000000e+00> : vector<16x128xf32>
      %122 = tpu.matmul %120, %121, %cst_69 {dimension_numbers = #tpu.dot_dimension_numbers<[1], [0], [0], [1], [0, 0, 1, 1], [], []>} : vector<16x64xbf16>, vector<64x128xbf16>, vector<16x128xf32> -> vector<16x128xf32>
      %c0_70 = arith.constant 0 : index
      %c0_71 = arith.constant 0 : index
      %123 = vector.load %arg6[%c0_70, %c0_71] : memref<1x128xf32, #tpu.memory_space<vmem>>, vector<1x128xf32>
      %124 = vector.broadcast %123 : vector<1x128xf32> to vector<16x128xf32>
      %125 = arith.addf %122, %124 : vector<16x128xf32>
      %cst_72 = arith.constant 0.000000e+00 : f32
      %126 = vector.broadcast %cst_72 : f32 to vector<16x128xf32>
      %127 = arith.cmpf oge, %125, %126 : vector<16x128xf32>
      %cst_73 = arith.constant 0.00999999977 : f32
      %128 = vector.broadcast %cst_73 : f32 to vector<16x128xf32>
      %129 = arith.mulf %128, %125 : vector<16x128xf32>
      %130 = arith.select %127, %125, %129 : vector<16x128xi1>, vector<16x128xf32>
      %c80 = arith.constant 80 : index
      %c0_74 = arith.constant 0 : index
      %131 = vector.load %arg11[%c80, %c0_74] : memref<96x128xf32, #tpu.memory_space<vmem>>, vector<16x128xf32>
      tpu.vector_store %arg11[%c80, %c0_74], %130 {strides = array<i32>} : memref<96x128xf32, #tpu.memory_space<vmem>>, vector<16x128xf32>,
    } else {
    }
    %c3_i32_13 = arith.constant 3 : i32
    %23 = arith.cmpi eq, %arg1, %c3_i32_13 : i32
    %24 = arith.extui %23 : i1 to i32
    %c0_i32_14 = arith.constant 0 : i32
    %25 = arith.cmpi ne, %24, %c0_i32_14 : i32
    scf.if %25 {
      %cst_64 = arith.constant 0.000000e+00 : f32
      %118 = vector.broadcast %cst_64 : f32 to vector<16x128xf32>
      %c80 = arith.constant 80 : index
      %c0_65 = arith.constant 0 : index
      %119 = vector.load %arg11[%c80, %c0_65] : memref<96x128xf32, #tpu.memory_space<vmem>>, vector<16x128xf32>
      tpu.vector_store %arg11[%c80, %c0_65], %118 {strides = array<i32>} : memref<96x128xf32, #tpu.memory_space<vmem>>, vector<16x128xf32>,
    } else {
    }
    %26 = tpu.iota {dimensions = array<i32: 0>} : vector<64x1xi32>
    %c16_i32 = arith.constant 16 : i32
    %c0_i32_15 = arith.constant 0 : i32
    %27 = arith.cmpi eq, %c16_i32, %c0_i32_15 : i32
    %c1_i32 = arith.constant 1 : i32
    %28 = arith.select %27, %c1_i32, %c16_i32 : i32
    %29 = vector.broadcast %28 : i32 to vector<64x1xi32>
    %30 = arith.remsi %26, %29 : vector<64x1xi32>
    %c0_i32_16 = arith.constant 0 : i32
    %31 = vector.broadcast %c0_i32_16 : i32 to vector<64x1xi32>
    %32 = arith.cmpi ne, %30, %31 : vector<64x1xi32>
    %c0_i32_17 = arith.constant 0 : i32
    %33 = vector.broadcast %c0_i32_17 : i32 to vector<64x1xi32>
    %34 = arith.cmpi slt, %30, %33 : vector<64x1xi32>
    %c0_i32_18 = arith.constant 0 : i32
    %35 = arith.cmpi slt, %28, %c0_i32_18 : i32
    %36 = vector.broadcast %35 : i1 to vector<64x1xi1>
    %37 = vector.broadcast %36 : vector<64x1xi1> to vector<64x1xi1>
    %38 = arith.xori %34, %37 : vector<64x1xi1>
    %39 = arith.andi %38, %32 : vector<64x1xi1>
    %40 = vector.broadcast %28 : i32 to vector<64x1xi32>
    %41 = arith.addi %30, %40 : vector<64x1xi32>
    %42 = arith.select %39, %41, %30 : vector<64x1xi1>, vector<64x1xi32>
    %c15_i32 = arith.constant 15 : i32
    %43 = vector.broadcast %c15_i32 : i32 to vector<64x1xi32>
    %44 = arith.cmpi slt, %42, %43 : vector<64x1xi32>
    %c0_i32_19 = arith.constant 0 : i32
    %45 = vector.broadcast %c0_i32_19 : i32 to vector<64x1xi32>
    %46 = arith.cmpi sgt, %42, %45 : vector<64x1xi32>
    %c0_20 = arith.constant 0 : index
    %c0_21 = arith.constant 0 : index
    %47 = vector.load %arg11[%c0_20, %c0_21] : memref<96x128xf32, #tpu.memory_space<vmem>>, vector<64x128xf32>
    %c1_i32_22 = arith.constant 1 : i32
    %48 = tpu.dynamic_rotate %47 by %c1_i32_22 dim 0 : vector<64x128xf32>, i32 -> vector<64x128xf32>
    %49 = arith.truncf %48 : vector<64x128xf32> to vector<64x128xbf16>
    %cst_23 = arith.constant 0.000000e+00 : bf16
    %50 = vector.shape_cast %46 : vector<64x1xi1> to vector<64x1xi1>
    %51 = vector.broadcast %50 : vector<64x1xi1> to vector<64x128xi1>
    %52 = vector.broadcast %cst_23 : bf16 to vector<64x128xbf16>
    %53 = arith.select %51, %49, %52 : vector<64x128xi1>, vector<64x128xbf16>
    %c0_24 = arith.constant 0 : index
    %c0_25 = arith.constant 0 : index
    %54 = vector.load %arg12[%c0_24, %c0_25] : memref<64x1152xbf16, #tpu.memory_space<vmem>>, vector<64x128xbf16>
    tpu.vector_store %arg12[%c0_24, %c0_25], %53 {strides = array<i32>} : memref<64x1152xbf16, #tpu.memory_space<vmem>>, vector<64x128xbf16>,
    %55 = arith.truncf %47 : vector<64x128xf32> to vector<64x128xbf16>
    %c0_26 = arith.constant 0 : index
    %c128 = arith.constant 128 : index
    %56 = vector.load %arg12[%c0_26, %c128] : memref<64x1152xbf16, #tpu.memory_space<vmem>>, vector<64x128xbf16>
    tpu.vector_store %arg12[%c0_26, %c128], %55 {strides = array<i32>} : memref<64x1152xbf16, #tpu.memory_space<vmem>>, vector<64x128xbf16>,
    %c63_i32 = arith.constant 63 : i32
    %57 = tpu.dynamic_rotate %47 by %c63_i32 dim 0 : vector<64x128xf32>, i32 -> vector<64x128xf32>
    %58 = arith.truncf %57 : vector<64x128xf32> to vector<64x128xbf16>
    %cst_27 = arith.constant 0.000000e+00 : bf16
    %59 = vector.shape_cast %44 : vector<64x1xi1> to vector<64x1xi1>
    %60 = vector.broadcast %59 : vector<64x1xi1> to vector<64x128xi1>
    %61 = vector.broadcast %cst_27 : bf16 to vector<64x128xbf16>
    %62 = arith.select %60, %58, %61 : vector<64x128xi1>, vector<64x128xbf16>
    %c0_28 = arith.constant 0 : index
    %c256 = arith.constant 256 : index
    %63 = vector.load %arg12[%c0_28, %c256] : memref<64x1152xbf16, #tpu.memory_space<vmem>>, vector<64x128xbf16>
    tpu.vector_store %arg12[%c0_28, %c256], %62 {strides = array<i32>} : memref<64x1152xbf16, #tpu.memory_space<vmem>>, vector<64x128xbf16>,
    %c16_29 = arith.constant 16 : index
    %c0_30 = arith.constant 0 : index
    %64 = vector.load %arg11[%c16_29, %c0_30] : memref<96x128xf32, #tpu.memory_space<vmem>>, vector<64x128xf32>
    %c1_i32_31 = arith.constant 1 : i32
    %65 = tpu.dynamic_rotate %64 by %c1_i32_31 dim 0 : vector<64x128xf32>, i32 -> vector<64x128xf32>
    %66 = arith.truncf %65 : vector<64x128xf32> to vector<64x128xbf16>
    %cst_32 = arith.constant 0.000000e+00 : bf16
    %67 = vector.shape_cast %46 : vector<64x1xi1> to vector<64x1xi1>
    %68 = vector.broadcast %67 : vector<64x1xi1> to vector<64x128xi1>
    %69 = vector.broadcast %cst_32 : bf16 to vector<64x128xbf16>
    %70 = arith.select %68, %66, %69 : vector<64x128xi1>, vector<64x128xbf16>
    %c0_33 = arith.constant 0 : index
    %c384 = arith.constant 384 : index
    %71 = vector.load %arg12[%c0_33, %c384] : memref<64x1152xbf16, #tpu.memory_space<vmem>>, vector<64x128xbf16>
    tpu.vector_store %arg12[%c0_33, %c384], %70 {strides = array<i32>} : memref<64x1152xbf16, #tpu.memory_space<vmem>>, vector<64x128xbf16>,
    %72 = arith.truncf %64 : vector<64x128xf32> to vector<64x128xbf16>
    %c0_34 = arith.constant 0 : index
    %c512 = arith.constant 512 : index
    %73 = vector.load %arg12[%c0_34, %c512] : memref<64x1152xbf16, #tpu.memory_space<vmem>>, vector<64x128xbf16>
    tpu.vector_store %arg12[%c0_34, %c512], %72 {strides = array<i32>} : memref<64x1152xbf16, #tpu.memory_space<vmem>>, vector<64x128xbf16>,
    %c63_i32_35 = arith.constant 63 : i32
    %74 = tpu.dynamic_rotate %64 by %c63_i32_35 dim 0 : vector<64x128xf32>, i32 -> vector<64x128xf32>
    %75 = arith.truncf %74 : vector<64x128xf32> to vector<64x128xbf16>
    %cst_36 = arith.constant 0.000000e+00 : bf16
    %76 = vector.shape_cast %44 : vector<64x1xi1> to vector<64x1xi1>
    %77 = vector.broadcast %76 : vector<64x1xi1> to vector<64x128xi1>
    %78 = vector.broadcast %cst_36 : bf16 to vector<64x128xbf16>
    %79 = arith.select %77, %75, %78 : vector<64x128xi1>, vector<64x128xbf16>
    %c0_37 = arith.constant 0 : index
    %c640 = arith.constant 640 : index
    %80 = vector.load %arg12[%c0_37, %c640] : memref<64x1152xbf16, #tpu.memory_space<vmem>>, vector<64x128xbf16>
    tpu.vector_store %arg12[%c0_37, %c640], %79 {strides = array<i32>} : memref<64x1152xbf16, #tpu.memory_space<vmem>>, vector<64x128xbf16>,
    %c32 = arith.constant 32 : index
    %c0_38 = arith.constant 0 : index
    %81 = vector.load %arg11[%c32, %c0_38] : memref<96x128xf32, #tpu.memory_space<vmem>>, vector<64x128xf32>
    %c1_i32_39 = arith.constant 1 : i32
    %82 = tpu.dynamic_rotate %81 by %c1_i32_39 dim 0 : vector<64x128xf32>, i32 -> vector<64x128xf32>
    %83 = arith.truncf %82 : vector<64x128xf32> to vector<64x128xbf16>
    %cst_40 = arith.constant 0.000000e+00 : bf16
    %84 = vector.shape_cast %46 : vector<64x1xi1> to vector<64x1xi1>
    %85 = vector.broadcast %84 : vector<64x1xi1> to vector<64x128xi1>
    %86 = vector.broadcast %cst_40 : bf16 to vector<64x128xbf16>
    %87 = arith.select %85, %83, %86 : vector<64x128xi1>, vector<64x128xbf16>
    %c0_41 = arith.constant 0 : index
    %c768 = arith.constant 768 : index
    %88 = vector.load %arg12[%c0_41, %c768] : memref<64x1152xbf16, #tpu.memory_space<vmem>>, vector<64x128xbf16>
    tpu.vector_store %arg12[%c0_41, %c768], %87 {strides = array<i32>} : memref<64x1152xbf16, #tpu.memory_space<vmem>>, vector<64x128xbf16>,
    %89 = arith.truncf %81 : vector<64x128xf32> to vector<64x128xbf16>
    %c0_42 = arith.constant 0 : index
    %c896 = arith.constant 896 : index
    %90 = vector.load %arg12[%c0_42, %c896] : memref<64x1152xbf16, #tpu.memory_space<vmem>>, vector<64x128xbf16>
    tpu.vector_store %arg12[%c0_42, %c896], %89 {strides = array<i32>} : memref<64x1152xbf16, #tpu.memory_space<vmem>>, vector<64x128xbf16>,
    %c63_i32_43 = arith.constant 63 : i32
    %91 = tpu.dynamic_rotate %81 by %c63_i32_43 dim 0 : vector<64x128xf32>, i32 -> vector<64x128xf32>
    %92 = arith.truncf %91 : vector<64x128xf32> to vector<64x128xbf16>
    %cst_44 = arith.constant 0.000000e+00 : bf16
    %93 = vector.shape_cast %44 : vector<64x1xi1> to vector<64x1xi1>
    %94 = vector.broadcast %93 : vector<64x1xi1> to vector<64x128xi1>
    %95 = vector.broadcast %cst_44 : bf16 to vector<64x128xbf16>
    %96 = arith.select %94, %92, %95 : vector<64x128xi1>, vector<64x128xbf16>
    %c0_45 = arith.constant 0 : index
    %c1024 = arith.constant 1024 : index
    %97 = vector.load %arg12[%c0_45, %c1024] : memref<64x1152xbf16, #tpu.memory_space<vmem>>, vector<64x128xbf16>
    tpu.vector_store %arg12[%c0_45, %c1024], %96 {strides = array<i32>} : memref<64x1152xbf16, #tpu.memory_space<vmem>>, vector<64x128xbf16>,
    %c0_46 = arith.constant 0 : index
    %c0_47 = arith.constant 0 : index
    %98 = vector.load %arg12[%c0_46, %c0_47] : memref<64x1152xbf16, #tpu.memory_space<vmem>>, vector<64x1152xbf16>
    %c0_48 = arith.constant 0 : index
    %c0_49 = arith.constant 0 : index
    %99 = vector.load %arg7[%c0_48, %c0_49] : memref<1152x128xbf16, #tpu.memory_space<vmem>>, vector<1152x128xbf16>
    %cst_50 = arith.constant dense<0.000000e+00> : vector<64x128xf32>
    %100 = tpu.matmul %98, %99, %cst_50 {dimension_numbers = #tpu.dot_dimension_numbers<[1], [0], [0], [1], [0, 0, 1, 1], [], []>} : vector<64x1152xbf16>, vector<1152x128xbf16>, vector<64x128xf32> -> vector<64x128xf32>
    %c0_51 = arith.constant 0 : index
    %c0_52 = arith.constant 0 : index
    %101 = vector.load %arg8[%c0_51, %c0_52] : memref<1x128xf32, #tpu.memory_space<vmem>>, vector<1x128xf32>
    %102 = vector.broadcast %101 : vector<1x128xf32> to vector<64x128xf32>
    %103 = arith.addf %100, %102 : vector<64x128xf32>
    %cst_53 = arith.constant 0.000000e+00 : f32
    %104 = vector.broadcast %cst_53 : f32 to vector<64x128xf32>
    %105 = arith.cmpf oge, %103, %104 : vector<64x128xf32>
    %cst_54 = arith.constant 0.00999999977 : f32
    %106 = vector.broadcast %cst_54 : f32 to vector<64x128xf32>
    %107 = arith.mulf %106, %103 : vector<64x128xf32>
    %108 = arith.select %105, %103, %107 : vector<64x128xi1>, vector<64x128xf32>
    %109 = arith.truncf %108 : vector<64x128xf32> to vector<64x128xbf16>
    %c0_55 = arith.constant 0 : index
    %c0_56 = arith.constant 0 : index
    %110 = vector.load %arg9[%c0_55, %c0_56] : memref<128x64xbf16, #tpu.memory_space<vmem>>, vector<128x64xbf16>
    %cst_57 = arith.constant dense<0.000000e+00> : vector<64x64xf32>
    %111 = tpu.matmul %109, %110, %cst_57 {dimension_numbers = #tpu.dot_dimension_numbers<[1], [0], [0], [1], [0, 0, 1, 1], [], []>} : vector<64x128xbf16>, vector<128x64xbf16>, vector<64x64xf32> -> vector<64x64xf32>
    %c0_58 = arith.constant 0 : index
    %c0_59 = arith.constant 0 : index
    %c0_60 = arith.constant 0 : index
    %112 = vector.load %arg2[%c0_58, %c0_59, %c0_60] : memref<1x64x64xf32, #tpu.memory_space<vmem>>, vector<1x64x64xf32>
    %113 = vector.shape_cast %112 : vector<1x64x64xf32> to vector<64x64xf32>
    %114 = arith.addf %111, %113 : vector<64x64xf32>
    %c0_61 = arith.constant 0 : index
    %c0_62 = arith.constant 0 : index
    %c0_63 = arith.constant 0 : index
    %115 = vector.load %arg10[%c0_61, %c0_62, %c0_63] : memref<1x64x64xf32, #tpu.memory_space<vmem>>, vector<1x64x64xf32>
    %116 = vector.shape_cast %115 : vector<1x64x64xf32> to vector<64x64xf32>
    %117 = vector.shape_cast %114 : vector<64x64xf32> to vector<1x64x64xf32>
    tpu.vector_store %arg10[%c0_61, %c0_62, %c0_63], %117 {strides = array<i32>} : memref<1x64x64xf32, #tpu.memory_space<vmem>>, vector<1x64x64xf32>,
    return
  }
  func.func @transform_0(%arg0: i32, %arg1: i32) -> (i32, i32, i32) {
    %c0_i32 = arith.constant 0 : i32
    %c0_i32_0 = arith.constant 0 : i32
    return %arg0, %arg1, %c0_i32 : i32, i32, i32
  }
  func.func @transform_1(%arg0: i32, %arg1: i32) -> (i32, i32, i32) {
    %c4_i32 = arith.constant 4 : i32
    %0 = arith.muli %arg1, %c4_i32 : i32
    %c1_i32 = arith.constant 1 : i32
    %1 = arith.subi %0, %c1_i32 : i32
    %c0_i32 = arith.constant 0 : i32
    %2 = arith.maxsi %1, %c0_i32 : i32
    %c0_i32_0 = arith.constant 0 : i32
    %c0_i32_1 = arith.constant 0 : i32
    return %arg0, %2, %c0_i32_0 : i32, i32, i32
  }
  func.func @transform_2(%arg0: i32, %arg1: i32) -> (i32, i32, i32) {
    %c1_i32 = arith.constant 1 : i32
    %0 = arith.addi %arg1, %c1_i32 : i32
    %c4_i32 = arith.constant 4 : i32
    %1 = arith.muli %0, %c4_i32 : i32
    %c15_i32 = arith.constant 15 : i32
    %2 = arith.minsi %1, %c15_i32 : i32
    %c0_i32 = arith.constant 0 : i32
    %c0_i32_0 = arith.constant 0 : i32
    return %arg0, %2, %c0_i32 : i32, i32, i32
  }
  func.func @transform_3(%arg0: i32, %arg1: i32) -> (i32, i32) {
    %c0_i32 = arith.constant 0 : i32
    %c0_i32_0 = arith.constant 0 : i32
    %c0_i32_1 = arith.constant 0 : i32
    return %c0_i32, %c0_i32_0 : i32, i32
  }
  func.func @transform_4(%arg0: i32, %arg1: i32) -> (i32, i32) {
    %c0_i32 = arith.constant 0 : i32
    %c0_i32_0 = arith.constant 0 : i32
    %c0_i32_1 = arith.constant 0 : i32
    return %c0_i32, %c0_i32_0 : i32, i32
  }
  func.func @transform_5(%arg0: i32, %arg1: i32) -> (i32, i32) {
    %c0_i32 = arith.constant 0 : i32
    %c0_i32_0 = arith.constant 0 : i32
    %c0_i32_1 = arith.constant 0 : i32
    return %c0_i32, %c0_i32_0 : i32, i32
  }
  func.func @transform_6(%arg0: i32, %arg1: i32) -> (i32, i32) {
    %c0_i32 = arith.constant 0 : i32
    %c0_i32_0 = arith.constant 0 : i32
    %c0_i32_1 = arith.constant 0 : i32
    return %c0_i32, %c0_i32_0 : i32, i32
  }
  func.func @transform_7(%arg0: i32, %arg1: i32) -> (i32, i32) {
    %c0_i32 = arith.constant 0 : i32
    %c0_i32_0 = arith.constant 0 : i32
    %c0_i32_1 = arith.constant 0 : i32
    return %c0_i32, %c0_i32_0 : i32, i32
  }
  func.func @transform_8(%arg0: i32, %arg1: i32) -> (i32, i32, i32) {
    %c0_i32 = arith.constant 0 : i32
    %c0_i32_0 = arith.constant 0 : i32
    return %arg0, %arg1, %c0_i32 : i32, i32, i32
  }
}

</mosaic_0001>

<bundles_post_ra>
// kernel: _lambda_.1
= control target key start
LH: loop header
LB: loop body
LE: loop exit
PB: predicated region body
PF: predicated region fallthrough
CT: control target
= control target key end

     0   :  { %s4713_s0 = inlined_call_operand.hbm [shape: f32[2,256,64], index: 0, kind: input, shape index: {}, may-alias: {0,1,2}]   ;;  %s4714_s1 = inlined_call_operand.hbm [shape: f32[2,256,64], index: 1, kind: input, shape index: {}, may-alias: {0,1,2}]   ;;  %s4715_s2 = inlined_call_operand.hbm [shape: f32[2,256,64], index: 2, kind: input, shape index: {}, may-alias: {0,1,2}]   ;;  %s4716_s3 = inlined_call_operand.hbm [shape: bf16[64,128], index: 3, kind: input, shape index: {}]   ;;  %s4717_s4 = inlined_call_operand.vmem [shape: f32[1,128], index: 4, kind: input, shape index: {}]   ;;  %s4718_s5 = inlined_call_operand.hbm [shape: bf16[1152,128], index: 5, kind: input, shape index: {}]   ;;  %s4719_s6 = inlined_call_operand.vmem [shape: f32[1,128], index: 6, kind: input, shape index: {}]   ;;  %s4720_s7 = inlined_call_operand.hbm [shape: bf16[128,64], index: 7, kind: input, shape index: {}]   ;;  %s4721_s8 = inlined_call_operand.hbm [shape: f32[2,256,64], index: 8, kind: output, shape index: {}]  }
   0x1   :  { %4757 = sst [smem:[#allocation38_spill]] %s4713_s0 }
   0x2   :  { %4758 = sst [smem:[#allocation39_spill]] %s4714_s1 }
   0x3   :  { %4759 = sst [smem:[#allocation40_spill]] %s4715_s2 }
   0x4   :  { %4760 = sst [smem:[#allocation41_spill]] %s4716_s3 }
   0x5   :  { %4761 = sst [smem:[#allocation42_spill]] %s4717_s4 }
   0x6   :  { %4762 = sst [smem:[#allocation43_spill]] %s4718_s5 }
   0x7   :  { %4763 = sst [smem:[#allocation44_spill]] %s4719_s6 }
   0x8   :  { %4764 = sst [smem:[#allocation45_spill]] %s4720_s7 }
   0x9   :  { %4765 = sst [smem:[#allocation46_spill]] %s4721_s8 }
   0xa   :  { %13 = vsyncpa [#allocation5], 0 }
   0xb   :  { %15 = vsyncpa [#allocation5 + $0x1], 0 }
   0xc   :  { %16 = vsyncpa [#allocation8], 0 }
   0xd   :  { %18 = vsyncpa [#allocation8 + $0x1], 0 }
   0xe   :  { %19 = vsyncpa [#allocation11], 0 }
   0xf   :  { %20 = vsyncpa [#allocation14], 0 }
  0x10   :  { %21 = vsyncpa [#allocation6], 0 }
  0x11   :  { %23 = vsyncpa [#allocation6 + $0x1], 0  ;;  %s3776_s27 = smov 0   ;;  %s3778_s28 = smov 0  }
  0x12   :  { %s3780_s29 = smov 0   ;;  %s3782_s30 = smov 0  }
  0x13   :  { %s3784_s9 = smov 0   ;;  %s3786_s10 = smov 0  }
  0x14   :  { %s3788_s11 = smov 0   ;;  %s3790_s12 = smov 0  }
  0x15   :  { %s3792_s13 = smov 0   ;;  %s3794_s14 = smov 0  }
  0x16   :  { %s3796_s15 = smov 0   ;;  %s3798_s16 = smov 0  }
  0x17   :  { %s3800_s17 = smov 0   ;;  %s3802_s18 = smov 0  }
  0x18 LB: > { %4766 = sst [smem:[#allocation22_spill]] %s3656_s27  ;;  %s3847_s19 = sadd.s32 4294967295, %s3708_s18   ;;  %s3708_s18 = sphi %s3802_s18, %s29_s18   ;;  %s3704_s17 = sphi %s3800_s17, %s4889_s17   ;;  %s3700_s16 = sphi %s3798_s16, %s4888_s16   ;;  %s3696_s15 = sphi %s3796_s15, %s4887_s15   ;;  %s3692_s14 = sphi %s3794_s14, %s4896_s14   ;;  %s3688_s13 = sphi %s3792_s13, %s4895_s13   ;;  %s3684_s12 = sphi %s3790_s12, %s4894_s12   ;;  %s3680_s11 = sphi %s3788_s11, %s4893_s11   ;;  %s3676_s10 = sphi %s3786_s10, %s4892_s10   ;;  %s3672_s9 = sphi %s3784_s9, %s4891_s9   ;;  %s3668_s30 = sphi %s3782_s30, %s4890_s30   ;;  %s3664_s29 = sphi %s3780_s29, %s4912_s29   ;;  %s3660_s28 = sphi %s3778_s28, %s4882_s28   ;;  %s3656_s27 = sphi %s3776_s27, %s4881_s27  }
  0x19   : > { %4767 = sst [smem:[#allocation23_spill]] %s3660_s28  ;;  %p2623_p0 = scmp.ge.s32.totalorder %s3708_s18, 1 }
  0x1a   : > { %4768 = sst [smem:[#allocation24_spill]] %s3664_s29  ;;  %p4723_p1 = scmp.eq.s32.totalorder %s3847_s19, 0 }
  0x1b   : > { %4769 = sst [smem:[#allocation25_spill]] %s3672_s9  ;;  %p279_p3 = scmp.lt.s32.totalorder %s3708_s18, 9 }
  0x1c   : > { %4770 = sst [smem:[#allocation26_spill]] %s3692_s14  ;;  %s3710_s21 = smov [#allocation10]  }
  0x1d   : > { %4771 = sst [smem:[#allocation27_spill]] %s3696_s15  ;;  %p3853_p4 = pnand %p2623_p0, %p279_p3 }
  0x1e   : > { %4772 = sst [smem:[#allocation28_spill]] %s3700_s16  ;;  %s291_s22 = sshll.u32 %s3710_s21, 4  ;;  %s292_s22 = int_to_ptr.vmem [resolvable:$true] %s291_s22 }
  0x1f   : > { %4773 = sst [smem:[#allocation29_spill]] %s3704_s17  ;;  %p3119_p5 = pneg %p3853_p4 }
  0x20   : > { %s4774_s20 = scalar_select %p3853_p4, 1, 0 }
  0x21   : > { %p3861_p6 = pnand %p3119_p5, %p4723_p1  ;;  %s4777_s3 = sld [smem:[#allocation41_spill]] }
  0x22   : > { %4775 = sst [smem:[#allocation30_spill]] %s4774_s20 }
  0x23   : > { %s4776_s23 = scalar_select %p3861_p6, 1, 0 }
  0x24   : > { %p3873_p8 = pneg %p3861_p6 }
  0x27   : > { %s3372_s26 = scalar_lea.hbm %s4777_s3, 512 }
  0x28   : > { %p3373_p7 = scmp.ne.s32.totalorder %s4777_s3, %s3372_s26  ;;  %p3379_p11 = scmp.lt.u32.totalorder %s3372_s26, %s4777_s3 }
  0x2a   : > { %p3375_p9 = pnand %p3873_p8, %p3373_p7 }
  0x2c   : > { %p3376_p10 = pneg %p3375_p9 }
  0x2e   : > { %p3381_p12 = pnand %p3379_p11, %p3376_p10 }
  0x30   : > { %3384 = shalt.err (!%p3381_p12)
}
  0x31   : > { %s3385_s24 = scalar_lea.vmem %s292_s22, 512  ;;  %p3393_p5 = scmp.lt.s32.totalorder %s292_s22, %s292_s22 }
  0x32   : > { %p3386_p13 = scmp.ne.s32.totalorder %s292_s22, %s3385_s24  ;;  %p3394_p2 = scmp.lt.s32.totalorder %s3385_s24, %s3385_s24 }
  0x34   : > { %p3388_p0 = pnand %p3386_p13, %p3873_p8  ;;  %p3395_p1 = por %p3394_p2, %p3393_p5 }
  0x36   : > { %p3389_p3 = pneg %p3388_p0 }
  0x38   : > { %p3396_p4 = pnand %p3395_p1, %p3389_p3 }
  0x3a   : > { %3399 = shalt.err (!%p3396_p4)
}
  0x3b   : > { %s4727_s8 = smov 64   ;;  %s4729_s6 = smov 4  }
  0x3c   : > { %3122 = dma.hbm_to_vmem [thread:$0]  (!%p3861_p6), %s4777_s3, 512, %s292_s22, [#allocation11], %s4727_s8, %s4727_s8, %s4729_s6  }
  0x3d   : > { %s38_s25 = sadd.s32 1, %s3700_s16  ;;  %s41_s26 = sadd.s32 1, %s3704_s17 }
  0x3e   : > { %p39_p1 = scmp.ge.s32.totalorder %s38_s25, 4  ;;  %p4743_p2 = scmp.eq.s32.totalorder %s3708_s18, 0 }
  0x3f   : > { %s2617_s24 = sshll.u32 %s3700_s16, 2  ;;  %s86_s4 = sadd.s32 1, %s3676_s10 }
  0x40   : > { %s4898_s25 = smov (%p39_p1, %s38_s25), 0  ;;  %s4900_s26 = smov (!%p39_p1, %s41_s26), %s3704_s17 }
  0x41   : > { %4779 = sst [smem:[#allocation31_spill]] %s4898_s25  ;;  %s46_s20 = ssub.s32 %s3700_s16, %s4898_s25 }
  0x42   : > { %s2618_s2 = sadd.s32 4294967295, %s2617_s24  ;;  %p43_p4 = scmp.ge.s32.totalorder %s4900_s26, 2 }
  0x43   : > { %p75_p7 = scmp.gt.s32.totalorder %s2618_s2, 0  ;;  %s2619_s22 = sshll.u32 %s4898_s25, 2 }
  0x44   : > { %p93_p9 = scmp.ne.s32.totalorder %s3676_s10, %s3672_s9  ;;  %s4902_s26 = smov (%p43_p4, %s4900_s26), 0 }
  0x45   : > { %4780 = sst [smem:[#allocation32_spill]] %s4902_s26  ;;  %s4904_s2 = smov (!%p75_p7, %s2618_s2), 0 }
  0x46   : > { %s3909_s14 = ssub.s32 %s3704_s17, %s4902_s26  ;;  %s2620_s15 = sadd.s32 4294967295, %s2619_s22 }
  0x47   : > { %4781 = sst [smem:[#allocation33_spill]] %s3909_s14  ;;  %s3912_s8 = sor.u32 %s46_s20, %s3909_s14 }
  0x48   : > { %p79_p10 = scmp.gt.s32.totalorder %s2620_s15, 0  ;;  %p3917_p12 = por %p93_p9, %p4743_p2 }
  0x49   : > { %p99_p13 = scmp.ne.s32.totalorder %s3672_s9, %s3668_s30  ;;  %s3923_s3 = sadd.s32 4, %s2617_s24 }
  0x4a   : > { %s4906_s15 = smov (!%p79_p10, %s2620_s15), 0  ;;  %4783 = sst [smem:[#allocation34_spill]] %s3923_s3 }
  0x4b   : > { %s82_s26 = ssub.s32 %s4904_s2, %s4906_s15  ;;  %p4784_p3 = scmp.eq.s32.totalorder %s3847_s19, 0 }
  0x4c   : > { %s83_s20 = sor.u32 %s82_s26, %s3909_s14  ;;  %s3933_s27 = sadd.s32 4, %s2619_s22 }
  0x4d   : > { %p3929_p5 = por %p99_p13, %p4784_p3  ;;  %p84_p1 = scmp.eq.s32.totalorder %s83_s20, 0 }
  0x4e   : > { %p4742_p7 = scmp.lt.s32.totalorder %s3708_s18, 8  ;;  %s3941_s24 = sshll.u32 %s3704_s17, 5 }
  0x4f   : > { %s4785_s25 = scalar_select %p3929_p5, 1, 0 }
  0x50   : > { %s3938_s30 = scalar_select %p84_p1, %s3676_s10, %s86_s4  }
  0x51   : > { %4786 = sst [smem:[#allocation35_spill]] %s4785_s25  ;;  %s360_s15 = sand.u32 1, %s3708_s18  }
  0x52   : > { %s362_s26 = sand.u32 1, %s3676_s10   ;;  %s2635_s14 = sshll.u32 %s4904_s2, 1 }
  0x53   : > { %s2632_s9 = sshll.u32 %s362_s26, 4  ;;  %s374_s28 = sadd.s32 %s2635_s14, %s3941_s24 }
  0x54   : > { %s2637_s3 = sshll.u32 %s374_s28, 7  ;;  %s364_s25 = scalar_lea.vmem [#allocation7], %s2632_s9 }
  0x55   : > { %s377_s20 = sshll.u32 %s364_s25, 4  ;;  %s4787_s1 = sld [smem:[#allocation39_spill]]  ;;  %s3951_s20 = int_to_ptr.vmem [resolvable:$true] %s377_s20 }
  0x56   : > { %p3957_p9 = pnand %p4742_p7, %p3917_p12  ;;  %s3713_s2 = smov [#allocation12]  }
  0x57   : > { %s307_s28 = sshll.u32 %s3713_s2, 4  ;;  %s3963_s0 = scalar_lea.sflag [#allocation8], %s360_s15  ;;  %s3961_s28 = int_to_ptr.vmem [resolvable:$true] %s307_s28 }
  0x58   : > { %p3402_p13 = pneg %p3957_p9 }
  0x5b   : > { %s3949_s22 = scalar_lea.hbm %s4787_s1, %s2637_s3  ;;  %s3405_s6 = scalar_lea.hbm %s4787_s1, 8192 }
  0x5c   : > { %s3400_s3 = scalar_lea.hbm %s3949_s22, 256  ;;  %p3406_p12 = scmp.lt.u32.totalorder %s3949_s22, %s4787_s1 }
  0x5d   : > { %p3401_p10 = scmp.ne.s32.totalorder %s3949_s22, %s3400_s3  ;;  %p3407_p4 = scmp.lt.u32.totalorder %s3405_s6, %s3400_s3 }
  0x5e   : > { %p3409_p7 = scmp.lt.u32.totalorder %s3400_s3, %s3949_s22 }
  0x5f   : > { %p3403_p3 = pnand %p3402_p13, %p3401_p10  ;;  %p3408_p0 = por %p3407_p4, %p3406_p12 }
  0x61   : > { %p3404_p1 = pneg %p3403_p3  ;;  %p3410_p2 = por %p3409_p7, %p3408_p0 }
  0x63   : > { %p3411_p11 = pnand %p3410_p2, %p3404_p1 }
  0x65   : > { %3414 = shalt.err (!%p3411_p11)
}
  0x66   : > { %s3415_s15 = scalar_lea.vmem %s3951_s20, 256  ;;  %s3714_s26 = smov [#allocation7]  }
  0x67   : > { %p3416_p10 = scmp.ne.s32.totalorder %s3951_s20, %s3415_s15  ;;  %s3420_s2 = sshll.u32 %s3714_s26, 4  ;;  %s3421_s2 = int_to_ptr.vmem [resolvable:$false] %s3420_s2 }
  0x68   : > { %s3422_s29 = scalar_lea.vmem %s3421_s2, 512  ;;  %p3423_p6 = scmp.lt.s32.totalorder %s3951_s20, %s3421_s2 }
  0x69   : > { %p3418_p3 = pnand %p3416_p10, %p3402_p13  ;;  %p3424_p4 = scmp.lt.s32.totalorder %s3422_s29, %s3415_s15 }
  0x6b   : > { %p3419_p5 = pneg %p3418_p3  ;;  %p3425_p12 = por %p3424_p4, %p3423_p6 }
  0x6d   : > { %p3426_p0 = pnand %p3425_p12, %p3419_p5 }
  0x6f   : > { %3429 = shalt.err (!%p3426_p0)
}
  0x70   : > { %s4747_s3 = smov 128   ;;  %s4749_s9 = smov 8  }
  0x71   : > { %3135 = dma.hbm_to_vmem [thread:$0]  (!%p3957_p9), %s3949_s22, 256, %s3951_s20, %s3963_s0, %s4747_s3, %s4747_s3, %s4749_s9  }
  0x72   : > { %s4789_s5 = sld [smem:[#allocation43_spill]] }
  0x78   : > { %s3430_s14 = scalar_lea.hbm %s4789_s5, 9216 }
  0x79   : > { %p3431_p6 = scmp.ne.s32.totalorder %s4789_s5, %s3430_s14  ;;  %p3437_p5 = scmp.lt.u32.totalorder %s3430_s14, %s4789_s5 }
  0x7b   : > { %p3433_p2 = pnand %p3431_p6, %p3873_p8 }
  0x7d   : > { %p3434_p11 = pneg %p3433_p2 }
  0x7f   : > { %p3439_p7 = pnand %p3437_p5, %p3434_p11 }
  0x81   : > { %3442 = shalt.err (!%p3439_p7)
}
  0x82   : > { %s3443_s20 = scalar_lea.vmem %s3961_s28, 9216  ;;  %p3451_p10 = scmp.lt.s32.totalorder %s3961_s28, %s3961_s28 }
  0x83   : > { %p3444_p9 = scmp.ne.s32.totalorder %s3961_s28, %s3443_s20  ;;  %p3452_p3 = scmp.lt.s32.totalorder %s3443_s20, %s3443_s20 }
  0x85   : > { %p3446_p13 = pnand %p3444_p9, %p3873_p8  ;;  %p3453_p4 = por %p3452_p3, %p3451_p10 }
  0x87   : > { %p3447_p1 = pneg %p3446_p13 }
  0x89   : > { %p3454_p12 = pnand %p3453_p4, %p3447_p1 }
  0x8b   : > { %3457 = shalt.err (!%p3454_p12)
}
  0x8c   : > { %p4790_p0 = scmp.ne.s32.totalorder %s4776_s23, 0  ;;  %s4791_s22 = smov 4  }
  0x8d   : > { %s4792_s4 = smov 64   ;;  %s3717_s14 = smov [#allocation13]  }
  0x8e   : > { %3125 = dma.hbm_to_vmem [thread:$0]  (!%p4790_p0), %s4789_s5, 9216, %s3961_s28, [#allocation11], %s4792_s4, %s4792_s4, %s4791_s22  }
  0x8f   : > { %s323_s15 = sshll.u32 %s3717_s14, 4  ;;  %s4793_s7 = sld [smem:[#allocation45_spill]]  ;;  %s324_s15 = int_to_ptr.vmem [resolvable:$true] %s323_s15 }
  0x95   : > { %s3458_s29 = scalar_lea.hbm %s4793_s7, 1024 }
  0x96   : > { %p3459_p6 = scmp.ne.s32.totalorder %s4793_s7, %s3458_s29  ;;  %p3465_p5 = scmp.lt.u32.totalorder %s3458_s29, %s4793_s7 }
  0x98   : > { %p3461_p2 = pnand %p3459_p6, %p3873_p8 }
  0x9a   : > { %p3462_p11 = pneg %p3461_p2 }
  0x9c   : > { %p3467_p7 = pnand %p3465_p5, %p3462_p11 }
  0x9e   : > { %3470 = shalt.err (!%p3467_p7)
}
  0x9f   : > { %s3471_s28 = scalar_lea.vmem %s324_s15, 1024  ;;  %p3479_p10 = scmp.lt.s32.totalorder %s324_s15, %s324_s15 }
  0xa0   : > { %p3472_p9 = scmp.ne.s32.totalorder %s324_s15, %s3471_s28  ;;  %p3480_p3 = scmp.lt.s32.totalorder %s3471_s28, %s3471_s28 }
  0xa2   : > { %p3474_p13 = pnand %p3472_p9, %p3873_p8  ;;  %p3481_p4 = por %p3480_p3, %p3479_p10 }
  0xa4   : > { %p3475_p1 = pneg %p3474_p13 }
  0xa6   : > { %p3482_p12 = pnand %p3481_p4, %p3475_p1 }
  0xa8   : > { %3485 = shalt.err (!%p3482_p12)
}
  0xa9   : > { %3128 = dma.hbm_to_vmem [thread:$0]  (!%p4790_p0), %s4793_s7, 1024, %s324_s15, [#allocation14], %s4792_s4, %s4792_s4, %s4791_s22  }
  0xaa   : > { %s2616_s23 = sadd.s32 4294967294, %s3708_s18   ;;  %s50_s21 = sadd.s32 1, %s3688_s13 }
  0xab   : > { %p4794_p8 = scmp.eq.s32.totalorder %s3912_s8, 0  ;;  %p57_p6 = scmp.ne.s32.totalorder %s3688_s13, %s3684_s12 }
  0xac   : > { %p63_p2 = scmp.ne.s32.totalorder %s3684_s12, %s3680_s11  ;;  %p272_p11 = scmp.eq.s32.totalorder %s2616_s23, 7 }
  0xad   : > { %s4046_s9 = scalar_select %p4794_p8, %s3688_s13, %s50_s21  }
  0xae   : > { %s337_s6 = sand.u32 1, %s3688_s13   ;;  %p4796_p5 = scmp.eq.s32.totalorder %s3708_s18, 0 }
  0xaf   : > { %4795 = sst [smem:[#allocation36_spill]] %s4046_s9  ;;  %p4797_p9 = scmp.eq.s32.totalorder %s3847_s19, 0 }
  0xb0   : > { %p59_p7 = por %p4796_p5, %p57_p6  ;;  %p4799_p1 = scmp.eq.s32.totalorder %s3847_s19, 7 }
  0xb1   : > { %p4057_p13 = por %p4797_p9, %p63_p2  ;;  %p4067_p0 = por %p272_p11, %p63_p2 }
  0xb2   : > { %p4063_p10 = por %p4799_p1, %p57_p6  ;;  %s2628_s4 = sshll.u32 %s337_s6, 6 }
  0xb3   : > { %s4801_s8 = scalar_select %p4067_p0, 1, 0 }
  0xb4   : > { %s4800_s22 = scalar_select %p4063_p10, 1, 0 }
  0xb5   : > { %4802 = sst [smem:[#allocation37_spill]] %s4801_s8  ;;  %s2629_s14 = sshll.u32 %s3700_s16, 3 }
  0xb6   : > { %s347_s15 = sadd.s32 %s3941_s24, %s2629_s14  ;;  %s341_s26 = scalar_lea.vmem [#allocation4], %s2628_s4 }
  0xb7   : > { %s350_s2 = sshll.u32 %s341_s26, 4  ;;  %s2631_s29 = sshll.u32 %s347_s15, 7  ;;  %s4073_s2 = int_to_ptr.vmem [resolvable:$true] %s350_s2 }
  0xb8   : > { %s4803_s1 = sld [smem:[#allocation38_spill]]  ;;  %p4804_p3 = scmp.lt.s32.totalorder %s3708_s18, 8 }
  0xb9   : > { %s4086_s21 = scalar_lea.sflag [#allocation5], %s337_s6 }
  0xba   : > { %p4082_p4 = pnand %p4804_p3, %p59_p7 }
  0xbc   : > { %p3488_p8 = pneg %p4082_p4 }
  0xbe   : > { %s4078_s3 = scalar_lea.hbm %s4803_s1, %s2631_s29  ;;  %s3491_s26 = scalar_lea.hbm %s4803_s1, 8192 }
  0xbf   : > { %s3486_s4 = scalar_lea.hbm %s4078_s3, 1024  ;;  %p3492_p11 = scmp.lt.u32.totalorder %s4078_s3, %s4803_s1 }
  0xc0   : > { %p3487_p12 = scmp.ne.s32.totalorder %s4078_s3, %s3486_s4  ;;  %p3493_p5 = scmp.lt.u32.totalorder %s3491_s26, %s3486_s4 }
  0xc1   : > { %p3495_p9 = scmp.lt.u32.totalorder %s3486_s4, %s4078_s3 }
  0xc2   : > { %p3489_p6 = pnand %p3488_p8, %p3487_p12  ;;  %p3494_p7 = por %p3493_p5, %p3492_p11 }
  0xc4   : > { %p3490_p2 = pneg %p3489_p6  ;;  %p3496_p1 = por %p3495_p9, %p3494_p7 }
  0xc6   : > { %p3497_p3 = pnand %p3496_p1, %p3490_p2 }
  0xc8   : > { %3500 = shalt.err (!%p3497_p3)
}
  0xc9   : > { %s3501_s6 = scalar_lea.vmem %s4073_s2, 1024  ;;  %s3718_s28 = smov [#allocation4]  }
  0xca   : > { %p3502_p12 = scmp.ne.s32.totalorder %s4073_s2, %s3501_s6  ;;  %s3506_s14 = sshll.u32 %s3718_s28, 4  ;;  %s3507_s14 = int_to_ptr.vmem [resolvable:$false] %s3506_s14 }
  0xcb   : > { %s3508_s15 = scalar_lea.vmem %s3507_s14, 2048  ;;  %p3509_p10 = scmp.lt.s32.totalorder %s4073_s2, %s3507_s14 }
  0xcc   : > { %p3504_p6 = pnand %p3502_p12, %p3488_p8  ;;  %p3510_p11 = scmp.lt.s32.totalorder %s3508_s15, %s3501_s6 }
  0xce   : > { %p3505_p0 = pneg %p3504_p6  ;;  %p3511_p5 = por %p3510_p11, %p3509_p10 }
  0xd0   : > { %p3512_p7 = pnand %p3511_p5, %p3505_p0 }
  0xd2   : > { %3515 = shalt.err (!%p3512_p7)
}
  0xd3   : > { %s4806_s4 = smov 8   ;;  %s4807_s26 = smov 128  }
  0xd4   : > { %s4808_s29 = sld [smem:[#allocation24_spill]]  ;;  %s4809_s20 = sld [smem:[#allocation34_spill]] }
  0xd5   : > { %s4810_s28 = sld [smem:[#allocation23_spill]]  ;;  %s4812_s6 = sld [smem:[#allocation33_spill]] }
  0xd6   : > { %s4811_s14 = sld [smem:[#allocation22_spill]]  ;;  %p4814_p0 = scmp.lt.s32.totalorder %s3933_s27, 15 }
  0xd7   : > { %3132 = dma.hbm_to_vmem [thread:$0]  (!%p4082_p4), %s4078_s3, 1024, %s4073_s2, %s4086_s21, %s4807_s26, %s4807_s26, %s4806_s4  }
  0xd8   : > { %s4910_s27 = smov (!%p4814_p0, %s3933_s27), 15  ;;  %p4815_p9 = scmp.eq.s32.totalorder %s3708_s18, 0 }
  0xd9   : > { %p4816_p12 = scmp.eq.s32.totalorder %s3847_s19, 0  ;;  %s4818_s9 = sld [smem:[#allocation40_spill]] }
  0xda   : > { %s122_s23 = sadd.s32 1, %s4808_s29  ;;  %p4813_p10 = scmp.lt.s32.totalorder %s4809_s20, 15 }
  0xdb   : > { %p129_p8 = scmp.ne.s32.totalorder %s4808_s29, %s4810_s28  ;;  %s389_s1 = sand.u32 1, %s4808_s29  }
  0xdc   : > { %s4908_s20 = smov (!%p4813_p10, %s4809_s20), 15  ;;  %p135_p2 = scmp.ne.s32.totalorder %s4810_s28, %s4811_s14 }
  0xdd   : > { %s118_s15 = ssub.s32 %s4908_s20, %s4910_s27  ;;  %p131_p1 = por %p129_p8, %p4815_p9 }
  0xde   : > { %s119_s5 = sor.u32 %s118_s15, %s4812_s6  ;;  %p4134_p6 = por %p135_p2, %p4816_p12 }
  0xdf   : > { %p120_p3 = scmp.eq.s32.totalorder %s119_s5, 0  ;;  %s2638_s2 = sshll.u32 %s389_s1, 4 }
  0xe0   : > { %s4817_s7 = scalar_select %p4134_p6, 1, 0 }
  0xe1   : > { %s2640_s3 = sshll.u32 %s4908_s20, 1  ;;  %s4912_s29 = smov (!%p120_p3, %s4808_s29), %s122_s23 }
  0xe2   : > { %s401_s21 = sadd.s32 %s2640_s3, %s3941_s24  ;;  %s391_s16 = scalar_lea.vmem [#allocation9], %s2638_s2 }
  0xe3   : > { %s2642_s17 = sshll.u32 %s401_s21, 7  ;;  %s404_s28 = sshll.u32 %s391_s16, 4  ;;  %s4147_s28 = int_to_ptr.vmem [resolvable:$true] %s404_s28 }
  0xe4   : > { %s4819_s8 = smov %s4818_s9  ;;  %s4145_s6 = scalar_lea.hbm %s4818_s9, %s2642_s17 }
  0xe5   : > { %p4820_p4 = scmp.lt.s32.totalorder %s3708_s18, 8  ;;  %s3516_s24 = scalar_lea.hbm %s4145_s6, 256 }
  0xe6   : > { %p3517_p5 = scmp.ne.s32.totalorder %s4145_s6, %s3516_s24  ;;  %s3521_s9 = scalar_lea.hbm %s4819_s8, 8192 }
  0xe7   : > { %p4151_p11 = pnand %p4820_p4, %p131_p1  ;;  %p3522_p8 = scmp.lt.u32.totalorder %s4145_s6, %s4819_s8 }
  0xe8   : > { %p3523_p2 = scmp.lt.u32.totalorder %s3521_s9, %s3516_s24  ;;  %p3525_p1 = scmp.lt.u32.totalorder %s3516_s24, %s4145_s6 }
  0xe9   : > { %p3518_p7 = pneg %p4151_p11 }
  0xea   : > { %p3524_p9 = por %p3523_p2, %p3522_p8 }
  0xeb   : > { %p3519_p10 = pnand %p3518_p7, %p3517_p5 }
  0xec   : > { %p3526_p3 = por %p3525_p1, %p3524_p9 }
  0xed   : > { %p3520_p0 = pneg %p3519_p10 }
  0xef   : > { %p3527_p12 = pnand %p3526_p3, %p3520_p0 }
  0xf1   : > { %3530 = shalt.err (!%p3527_p12)
}
  0xf2   : > { %s3531_s23 = scalar_lea.vmem %s4147_s28, 256  ;;  %s3719_s15 = smov [#allocation9]  }
  0xf3   : > { %p3532_p4 = scmp.ne.s32.totalorder %s4147_s28, %s3531_s23  ;;  %s3536_s2 = sshll.u32 %s3719_s15, 4  ;;  %s3537_s2 = int_to_ptr.vmem [resolvable:$false] %s3536_s2 }
  0xf4   : > { %s3538_s3 = scalar_lea.vmem %s3537_s2, 512  ;;  %p3539_p6 = scmp.lt.s32.totalorder %s4147_s28, %s3537_s2 }
  0xf5   : > { %p3534_p5 = pnand %p3532_p4, %p3518_p7  ;;  %p3540_p8 = scmp.lt.s32.totalorder %s3538_s3, %s3531_s23 }
  0xf7   : > { %p3535_p10 = pneg %p3534_p5  ;;  %p3541_p2 = por %p3540_p8, %p3539_p6 }
  0xf9   : > { %p3542_p9 = pnand %p3541_p2, %p3535_p10 }
  0xfb   : > { %3545 = shalt.err (!%p3542_p9)
}
  0xfc   : > { %3138 = dma.hbm_to_vmem [thread:$0]  (!%p4151_p11), %s4145_s6, 256, %s4147_s28, %s3963_s0, %s4807_s26, %s4807_s26, %s4806_s4  }
  0xfd   : > { %s4822_s21 = sld [smem:[#allocation30_spill]] }
 0x103   : > { %p4823_p7 = scmp.ne.s32.totalorder %s4822_s21, 0 }
 0x104   : > { %s4187_s14 = sand.u32 (!%p4823_p7), 1, %s3684_s12  }
 0x105   : > { %416 = sbr.rel (%p4823_p7) target bundleno = 1583 (0x62f), region = 52  ;;  %s2644_s27 = sshll.u32 (!%p4823_p7), %s4187_s14, 6 }
 0x106   : > { %s419_s24 = scalar_lea.sflag (!%p4823_p7), [#allocation5], %s4187_s14  ;;  %s4193_s5 = scalar_lea.vmem (!%p4823_p7), [#allocation4], %s2644_s27 }
 0x10c   : > { %3631 = dma.done.wait (%p4057_p13), %s419_s24, 1024  }
 0x10d   : > { %3633 = vsyncadd (%p4057_p13), %s419_s24, 4294966272  ;;  %s4824_s0 = sld [smem:[#allocation25_spill]]  ;;  %s4825_s4 = sld [smem:[#allocation35_spill]] }
 0x10e   : > { %s427_s26 = sand.u32 1, %s3847_s19  }
 0x10f   : > { %s428_s16 = scalar_lea.sflag [#allocation8], %s427_s26 }
 0x113   : > { %s429_s28 = sand.u32 1, %s4824_s0   ;;  %p4826_p6 = scmp.ne.s32.totalorder %s4825_s4, 0 }
 0x114   : > { %s4201_s6 = sshll.u32 %s429_s28, 4 }
 0x115   : > { %s431_s17 = scalar_lea.vmem [#allocation7], %s4201_s6 }
 0x116   : > { %3635 = dma.done.wait (%p4826_p6), %s428_s16, 256  }
 0x117   : > { %3637 = vsyncadd (%p4826_p6), %s428_s16, 4294967040  ;;  %s4827_s9 = sld [smem:[#allocation23_spill]]  ;;  %p4828_p13 = scmp.ne.s32.totalorder %s4817_s7, 0 }
 0x11d   : > { %s438_s1 = sand.u32 1, %s4827_s9  }
 0x11e   : > { %s4209_s25 = sshll.u32 %s438_s1, 4 }
 0x11f   : > { %s440_s20 = scalar_lea.vmem [#allocation9], %s4209_s25 }
 0x120   : > { %3639 = dma.done.wait (%p4828_p13), %s428_s16, 256  }
 0x121   : > { %3641 = vsyncadd (%p4828_p13), %s428_s16, 4294967040  ;;  %p4829_p11 = scmp.eq.s32.totalorder %s3847_s19, 0 }
 0x123   : > { %3643 = dma.done.wait (%p4829_p11), [#allocation11], 9728   ;;  %p4830_p0 = pmov %p4829_p11 }
 0x125   : > { %3645 = vsyncadd (%p4830_p0), [#allocation11], 4294957568  ;;  %p4831_p1 = pmov %p4830_p0 }
 0x126   : > { %p4832_p3 = pmov %p4830_p0 }
 0x127   : > { %3647 = dma.done.wait (%p4831_p1), [#allocation14], 1024  }
 0x128   : > { %3649 = vsyncadd (%p4832_p3), [#allocation14], 4294966272  ;;  %v3280_v0 = vld [vmem:[#allocation10] sm:$0xff]   ;;  %v3281_v1 = vld [vmem:[#allocation10 + $0x8] sm:$0xff]   ;;  %vm561_vm0 = vcmask 523264   ;;  %s4833_s23 = sld [smem:[#allocation42_spill]] }
 0x129   : > { %3003 = vmatprep.subr.bf16.mxu0 %v3280_v0  ;;  %3091 = vmatprep.subr.bf16.mxu1 %v3280_v0  ;;  %v3282_v2 = vld [vmem:[#allocation10 + $0x10] sm:$0xff]   ;;  %v510_v3 = vld [vmem:[%s4193_s5] sm:$0xff]  ;;  %v511_v4 = vld [vmem:[%s4193_s5 + $0x8] sm:$0xff]  ;;  %s4241_s15 = scalar_lea.vmem [#allocation15], %s2644_s27  ;;  %s4834_s2 = sld [smem:[#allocation26_spill]] }
 0x12a   : > { %3004 = vmatpush3.bf16.msra.mxu0 %v3280_v0  ;;  %3095 = vmatpush3.bf16.msra.mxu1 %v3280_v0  ;;  %v514_v5 = vld [vmem:[%s4193_s5 + $0x20] sm:$0xff]  ;;  %v518_v6 = vpack.c.bf16 %v511_v4, %v510_v3  ;;  %v515_v7 = vld [vmem:[%s4193_s5 + $0x28] sm:$0xff]  ;;  %v3283_v9 = vld [vmem:[#allocation10 + $0x18] sm:$0xff]  }
 0x12b   : > { %3005 = vmatprep.subr.bf16.mxu0 %v3281_v1  ;;  %3092 = vmatprep.subr.bf16.mxu1 %v3281_v1  ;;  %v520_v8 = vpack.c.bf16 %v515_v7, %v514_v5  ;;  %v512_v10 = vld [vmem:[%s4193_s5 + $0x10] sm:$0xff]  ;;  %v513_v11 = vld [vmem:[%s4193_s5 + $0x18] sm:$0xff] }
 0x12c   : > { %3011 = vmatprep.mubr.msk.bf16.mxu0 %vm561_vm0, %v518_v6  ;;  %v516_v12 = vld [vmem:[%s4193_s5 + $0x30] sm:$0xff]  ;;  %v517_v13 = vld [vmem:[%s4193_s5 + $0x38] sm:$0xff]  ;;  %v519_v14 = vpack.c.bf16 %v513_v11, %v512_v10 }
 0x12d   : > { %3015 = vmatprep.mubr.msk.bf16.mxu1 %vm561_vm0, %v520_v8  ;;  %v521_v15 = vpack.c.bf16 %v517_v13, %v516_v12 }
 0x12e   : > { %3006 = vmatpush3.bf16.msra.mxu0 %v3281_v1  ;;  %3096 = vmatpush3.bf16.msra.mxu1 %v3281_v1  ;;  %v2651_v16 = vld [vmem:[%s4833_s23] ss:$0 sm:$0xff] }
 0x12f   : > { %3007 = vmatprep.subr.bf16.mxu0 %v3282_v2  ;;  %3093 = vmatprep.subr.bf16.mxu1 %v3282_v2  ;;  %p2660_p12 = scmp.le.s32.totalorder %s4834_s2, 0 }
 0x130   : > { %v3284_v49 = vld [vmem:[#allocation10] sm:$0xff] (!%p2660_p12)   ;;  %v3720_v50 = vmov (!%p2660_p12), 0.0   ;;  %v3285_v51 = vld [vmem:[#allocation10 + $0x8] sm:$0xff] (!%p2660_p12)   ;;  %vm3721_vm9 = vmmov (!%p2660_p12), 0   ;;  %v3286_v52 = vld [vmem:[#allocation10 + $0x10] sm:$0xff] (!%p2660_p12)   ;;  %s4835_s27 = sld [smem:[#allocation42_spill]] (!%p2660_p12) }
 0x131   : > { %v3287_v53 = vld [vmem:[#allocation10 + $0x18] sm:$0xff] (!%p2660_p12)   ;;  %v675_v54 = vld [vmem:[%s431_s17] sm:$0xff] (!%p2660_p12) }
 0x132   : > { %3008 = vmatpush3.bf16.msra.mxu0 %v3282_v2  ;;  %3097 = vmatpush3.bf16.msra.mxu1 %v3282_v2  ;;  %v676_v55 = vld [vmem:[%s431_s17 + $0x8] sm:$0xff] (!%p2660_p12) }
 0x133   : > { %3009 = vmatprep.subr.bf16.mxu0 %v3283_v9  ;;  %3094 = vmatprep.subr.bf16.mxu1 %v3283_v9  ;;  %v677_v56 = vpack.c.bf16 (!%p2660_p12), %v676_v55, %v675_v54 }
 0x136   : > { %3010 = vmatpush3.bf16.msra.mxu0 %v3283_v9  ;;  %3098 = vmatpush3.bf16.msra.mxu1 %v3283_v9  ;;  %v2661_v57 = vld [vmem:[%s4835_s27] ss:$0 sm:$0xff] (!%p2660_p12) }
 0x137   : > { %3019 = vmatprep.subr.bf16.mxu0 (!%p2660_p12), %v3720_v50 }
 0x139   : > { %3012 = vmatmul.mubr.msk.bf16.vlgmr.msra.gmra.mrb[0].mxu0 %vm561_vm0, %v519_v14  ;;  %3016 = vmatmul.mubr.msk.bf16.vlgmr.msra.gmra.mrb[0].mxu1 %vm561_vm0, %v521_v15 }
 0x13a   : > { %3020 = vmatpush3.bf16.msra.mxu0 (!%p2660_p12), %v3284_v49  ;;  %3027 = vmatprep.mubr.msk.bf16.mxu0 (!%p2660_p12), %vm3721_vm9, %v3720_v50 }
 0x13b   : > { %3021 = vmatprep.subr.bf16.mxu0 (!%p2660_p12), %v3720_v50 }
 0x13e   : > { %3022 = vmatpush3.bf16.msra.mxu0 (!%p2660_p12), %v3285_v51 }
 0x13f   : > { %3023 = vmatprep.subr.bf16.mxu0 (!%p2660_p12), %v3720_v50 }
 0x142   : > { %3024 = vmatpush3.bf16.msra.mxu0 (!%p2660_p12), %v3286_v52 }
 0x143   : > { %3025 = vmatprep.subr.bf16.mxu0 (!%p2660_p12), %v3720_v50 }
 0x146   : > { %3026 = vmatpush3.bf16.msra.mxu0 (!%p2660_p12), %v3287_v53 }
 0x20c   : > { %v3013_v17 = vpop.f32.mrb[0].mxu0  ;;  %v3017_v18 = vpop.f32.mrb[0].mxu1 }
 0x20d   : > { %v617_v19 = vadd.f32 %v3013_v17, %v2651_v16  ;;  %v633_v20 = vadd.f32 %v3017_v18, %v2651_v16  ;;  %v608_v21 = vpop.f32.mrb[1].mxu0  ;;  %v624_v22 = vpop.f32.mrb[1].mxu1 }
 0x20e   : > { %v609_v23 = vadd.f32 %v2651_v16, %v608_v21  ;;  %v625_v24 = vadd.f32 %v2651_v16, %v624_v22  ;;  %v3014_v25 = vpop.f32.mrb[2].mxu0  ;;  %v3018_v26 = vpop.f32.mrb[2].mxu1 }
 0x20f   : > { %vm641_vm1 = vcmp.ge.f32.partialorder %v617_v19, 0.0  ;;  %v649_v27 = vmul.f32 0.01, %v617_v19  ;;  %vm645_vm2 = vcmp.ge.f32.partialorder %v633_v20, 0.0  ;;  %v653_v28 = vmul.f32 0.01, %v633_v20 }
 0x210   : > { %vm639_vm3 = vcmp.ge.f32.partialorder %v609_v23, 0.0  ;;  %v647_v29 = vmul.f32 0.01, %v609_v23  ;;  %vm643_vm4 = vcmp.ge.f32.partialorder %v625_v24, 0.0  ;;  %v651_v30 = vmul.f32 0.01, %v625_v24 }
 0x211   : > { %v657_v31 = vsel %vm641_vm1, %v617_v19, %v649_v27  ;;  %v661_v32 = vsel %vm645_vm2, %v633_v20, %v653_v28  ;;  %v620_v33 = vadd.f32 %v3014_v25, %v2651_v16  ;;  %v636_v34 = vadd.f32 %v3018_v26, %v2651_v16  ;;  %v611_v35 = vpop.f32.mrb[3].mxu0  ;;  %v627_v36 = vpop.f32.mrb[3].mxu1  ;;  %3028 = vmatmul.mubr.msk.bf16.vlgmr.msra.gmra.mrb[0].mxu0 (!%p2660_p12), %vm561_vm0, %v677_v56 }
 0x212   : > { %665 = vst [vmem:[#allocation2 + $0x20] sm:$0xff] %v657_v31  ;;  %669 = vst [vmem:[#allocation2 + $0x40] sm:$0xff] %v661_v32  ;;  %v655_v37 = vsel %vm639_vm3, %v609_v23, %v647_v29  ;;  %v659_v38 = vsel %vm643_vm4, %v625_v24, %v651_v30  ;;  %v612_v39 = vadd.f32 %v2651_v16, %v611_v35  ;;  %674 = sbr.rel (%p2660_p12) target bundleno = 749 (0x2ed), region = 80 }
 0x213   : > { %v628_v40 = vadd.f32 %v2651_v16, %v627_v36  ;;  %663 = vst [vmem:[#allocation2 + $0x10] sm:$0xff] %v655_v37  ;;  %667 = vst [vmem:[#allocation2 + $0x30] sm:$0xff] %v659_v38  ;;  %vm642_vm5 = vcmp.ge.f32.partialorder %v620_v33, 0.0  ;;  %v650_v41 = vmul.f32 0.01, %v620_v33  ;;  %vm646_vm6 = vcmp.ge.f32.partialorder %v636_v34, 0.0 }
 0x214   : > { %v654_v42 = vmul.f32 0.01, %v636_v34  ;;  %vm640_vm7 = vcmp.ge.f32.partialorder %v612_v39, 0.0  ;;  %v648_v43 = vmul.f32 0.01, %v612_v39 }
 0x215   : > { %vm644_vm8 = vcmp.ge.f32.partialorder %v628_v40, 0.0  ;;  %v652_v44 = vmul.f32 0.01, %v628_v40  ;;  %v658_v45 = vsel %vm642_vm5, %v620_v33, %v650_v41 }
 0x216   : > { %v662_v46 = vsel %vm646_vm6, %v636_v34, %v654_v42  ;;  %666 = vst [vmem:[#allocation2 + $0x28] sm:$0xff] %v658_v45  ;;  %v656_v47 = vsel %vm640_vm7, %v612_v39, %v648_v43 }
 0x217   : > { %670 = vst [vmem:[#allocation2 + $0x48] sm:$0xff] %v662_v46  ;;  %v660_v48 = vsel %vm644_vm8, %v628_v40, %v652_v44  ;;  %664 = vst [vmem:[#allocation2 + $0x18] sm:$0xff] %v656_v47 }
 0x218   : > { %668 = vst [vmem:[#allocation2 + $0x38] sm:$0xff] %v660_v48 }
 0x2e4   : > { %v754_v58 = vpop.f32.mrb[0].mxu0 }
 0x2e5   : > { %v755_v59 = vadd.f32 %v2661_v57, %v754_v58  ;;  %v3029_v60 = vpop.f32.mrb[1].mxu0 }
 0x2e6   : > { %v757_v61 = vpop.f32.mrb[2].mxu0 }
 0x2e7   : > { %vm761_vm10 = vcmp.ge.f32.partialorder %v755_v59, 0.0  ;;  %v763_v62 = vmul.f32 0.01, %v755_v59  ;;  %v758_v63 = vadd.f32 %v2661_v57, %v757_v61  ;;  %v3030_v0 = vpop.f32.mrb[3].mxu0 }
 0x2e9   : > { %v765_v1 = vsel %vm761_vm10, %v755_v59, %v763_v62  ;;  %vm762_vm11 = vcmp.ge.f32.partialorder %v758_v63, 0.0  ;;  %v764_v2 = vmul.f32 0.01, %v758_v63 }
 0x2ea   : > { %767 = vst [vmem:[#allocation2] sm:$0xff] %v765_v1 }
 0x2eb   : > { %v766_v3 = vsel %vm762_vm11, %v758_v63, %v764_v2 }
 0x2ec   : > { %768 = vst [vmem:[#allocation2 + $0x8] sm:$0xff] %v766_v3 }
 0x2ed PF: > { %s4836_s24 = sld [smem:[#allocation26_spill]] }
 0x2f3   : > { %p2667_p4 = scmp.ne.s32.totalorder %s4836_s24, 0 }
 0x2f4   : > { %v3722_v4 = vmov (!%p2667_p4), 0.0  }
 0x2f5   : > { %772 = sbr.rel (%p2667_p4) target bundleno = 764 (0x2fc), region = 84  ;;  %773 = vst [vmem:[#allocation2] sm:$0xff] (!%p2667_p4), %v3722_v4  ;;  %774 = vst [vmem:[#allocation2 + $0x8] sm:$0xff] (!%p2667_p4), %v3722_v4 }
 0x2fc PF: > { %s4837_s0 = sld [smem:[#allocation26_spill]] }
 0x302   : > { %p2668_p5 = scmp.ge.s32.totalorder %s4837_s0, 3 }
 0x303   : > { %v3288_v5 = vld [vmem:[#allocation10] sm:$0xff] (!%p2668_p5)   ;;  %v3723_v6 = vmov (!%p2668_p5), 0.0   ;;  %v3289_v7 = vld [vmem:[#allocation10 + $0x8] sm:$0xff] (!%p2668_p5)   ;;  %vm3724_vm12 = vmmov (!%p2668_p5), 0   ;;  %v3290_v8 = vld [vmem:[#allocation10 + $0x10] sm:$0xff] (!%p2668_p5)   ;;  %s4838_s28 = sld [smem:[#allocation42_spill]] (!%p2668_p5) }
 0x304   : > { %778 = sbr.rel (%p2668_p5) target bundleno = 1008 (0x3f0), region = 88  ;;  %3031 = vmatprep.subr.bf16.mxu0 (!%p2668_p5), %v3723_v6  ;;  %3039 = vmatprep.mubr.msk.bf16.mxu0 (!%p2668_p5), %vm3724_vm12, %v3723_v6  ;;  %v3291_v9 = vld [vmem:[#allocation10 + $0x18] sm:$0xff] (!%p2668_p5)   ;;  %v779_v10 = vld [vmem:[%s440_s20] sm:$0xff] (!%p2668_p5) }
 0x305   : > { %3032 = vmatpush3.bf16.msra.mxu0 (!%p2668_p5), %v3288_v5  ;;  %v780_v11 = vld [vmem:[%s440_s20 + $0x8] sm:$0xff] (!%p2668_p5) }
 0x306   : > { %3033 = vmatprep.subr.bf16.mxu0 (!%p2668_p5), %v3723_v6  ;;  %v781_v12 = vpack.c.bf16 (!%p2668_p5), %v780_v11, %v779_v10 }
 0x309   : > { %3034 = vmatpush3.bf16.msra.mxu0 (!%p2668_p5), %v3289_v7  ;;  %v2669_v13 = vld [vmem:[%s4838_s28] ss:$0 sm:$0xff] (!%p2668_p5) }
 0x30a   : > { %3035 = vmatprep.subr.bf16.mxu0 (!%p2668_p5), %v3723_v6 }
 0x30d   : > { %3036 = vmatpush3.bf16.msra.mxu0 %v3290_v8 }
 0x30e   : > { %3037 = vmatprep.subr.bf16.mxu0 %v3723_v6 }
 0x311   : > { %3038 = vmatpush3.bf16.msra.mxu0 %v3291_v9 }
 0x314   : > { %3040 = vmatmul.mubr.msk.bf16.vlgmr.msra.gmra.mrb[0].mxu0 %vm561_vm0, %v781_v12 }
 0x3e7   : > { %v858_v14 = vpop.f32.mrb[0].mxu0 }
 0x3e8   : > { %v859_v15 = vadd.f32 %v2669_v13, %v858_v14  ;;  %v3041_v16 = vpop.f32.mrb[1].mxu0 }
 0x3e9   : > { %v861_v17 = vpop.f32.mrb[2].mxu0 }
 0x3ea   : > { %vm865_vm13 = vcmp.ge.f32.partialorder %v859_v15, 0.0  ;;  %v867_v18 = vmul.f32 0.01, %v859_v15  ;;  %v862_v19 = vadd.f32 %v2669_v13, %v861_v17  ;;  %v3042_v20 = vpop.f32.mrb[3].mxu0 }
 0x3ec   : > { %v869_v21 = vsel %vm865_vm13, %v859_v15, %v867_v18  ;;  %vm866_vm14 = vcmp.ge.f32.partialorder %v862_v19, 0.0  ;;  %v868_v22 = vmul.f32 0.01, %v862_v19 }
 0x3ed   : > { %871 = vst [vmem:[#allocation2 + $0x50] sm:$0xff] %v869_v21 }
 0x3ee   : > { %v870_v23 = vsel %vm866_vm14, %v862_v19, %v868_v22 }
 0x3ef   : > { %872 = vst [vmem:[#allocation2 + $0x58] sm:$0xff] %v870_v23 }
 0x3f0 PF: > { %s4839_s6 = sld [smem:[#allocation26_spill]] }
 0x3f6   : > { %p2675_p10 = scmp.ne.s32.totalorder %s4839_s6, 3 }
 0x3f7   : > { %v3725_v24 = vmov (!%p2675_p10), 0.0  }
 0x3f8   : > { %876 = sbr.rel (%p2675_p10) target bundleno = 1023 (0x3ff), region = 92  ;;  %877 = vst [vmem:[#allocation2 + $0x50] sm:$0xff] (!%p2675_p10), %v3725_v24  ;;  %878 = vst [vmem:[#allocation2 + $0x58] sm:$0xff] (!%p2675_p10), %v3725_v24 }
 0x3ff PF: > { %v3292_v25 = vld [vmem:[#allocation12 + $0x40] sm:$0xff]   ;;  %v3296_v29 = vld [vmem:[#allocation12 + $0x48] sm:$0xff]   ;;  %v3300_v33 = vld [vmem:[#allocation12 + $0x50] sm:$0xff]   ;;  %v879_v38 = vlaneseq  ;;  %vm3726_vm6 = vmmov 1   ;;  %v3727_v14 = vmov 0   ;;  %s4872_s9 = sld [smem:[#allocation44_spill]] }
 0x400   : > { %v3293_v26 = vld [vmem:[#allocation12] sm:$0xff]   ;;  %2819 = vmatprep.subr.bf16.mxu0 %v3292_v25  ;;  %v3297_v30 = vld [vmem:[#allocation12 + $0x8] sm:$0xff]   ;;  %v3301_v34 = vld [vmem:[#allocation12 + $0x10] sm:$0xff]   ;;  %s4873_s1 = sld [smem:[#allocation26_spill]]  ;;  %s4874_s25 = sld [smem:[#allocation27_spill]] }
 0x401   : > { %v3294_v27 = vld [vmem:[#allocation12 + $0xc0] sm:$0xff]   ;;  %2820 = vmatpush3.bf16.msra.mxu0 %v3293_v26  ;;  %v3298_v31 = vld [vmem:[#allocation12 + $0xc8] sm:$0xff]   ;;  %v3302_v35 = vld [vmem:[#allocation12 + $0xd0] sm:$0xff]   ;;  %v4263_v43 = vshrl.u32 %v879_v38, 7  ;;  %s2447_s2 = sshll.u32 %s4241_s15, 4  ;;  %s4875_s27 = sld [smem:[#allocation46_spill]]  ;;  %s4629_s2 = int_to_ptr.vmem [resolvable:$true] %s2447_s2 }
 0x402   : > { %v3295_v28 = vld [vmem:[#allocation12 + $0x80] sm:$0xff]   ;;  %2859 = vmatprep.subr.bf16.mxu1 %v3294_v27  ;;  %2821 = vmatprep.subr.bf16.mxu0 %v3296_v29  ;;  %v3299_v32 = vld [vmem:[#allocation12 + $0x88] sm:$0xff]   ;;  %v3303_v36 = vld [vmem:[#allocation12 + $0x90] sm:$0xff]   ;;  %s3546_s4 = scalar_lea.vmem %s4629_s2, 1024  ;;  %p4877_p2 = scmp.ne.s32.totalorder %s4800_s22, 0 }
 0x403   : > { %2860 = vmatpush3.bf16.msra.mxu1 %v3295_v28  ;;  %v3304_v37 = vld [vmem:[#allocation12 + $0x58] sm:$0xff]   ;;  %v3308_v42 = vld [vmem:[#allocation12 + $0x60] sm:$0xff]   ;;  %v3312_v47 = vld [vmem:[#allocation12 + $0x68] sm:$0xff]   ;;  %v892_v48 = vand.u32 15, %v4263_v43  ;;  %v881_v50 = vadd.s32 8, %v4263_v43  ;;  %v882_v52 = vadd.s32 16, %v4263_v43  ;;  %p3547_p8 = scmp.ne.s32.totalorder %s4629_s2, %s3546_s4 }
 0x404   : > { %2861 = vmatprep.subr.bf16.mxu1 %v3298_v31  ;;  %v3305_v39 = vld [vmem:[#allocation12 + $0x18] sm:$0xff]   ;;  %v3309_v44 = vld [vmem:[#allocation12 + $0x20] sm:$0xff]   ;;  %v3313_v49 = vld [vmem:[#allocation12 + $0x28] sm:$0xff]   ;;  %vm1016_vm15 = vcmp.lt.s32.totalorder %v4263_v43, 1  ;;  %v883_v61 = vadd.s32 24, %v4263_v43  ;;  %vm1101_vm2 = vcmp.lt.s32.totalorder %v4263_v43, 7 }
 0x405   : > { %2822 = vmatpush3.bf16.msra.mxu0 %v3297_v30  ;;  %v3306_v40 = vld [vmem:[#allocation12 + $0xd8] sm:$0xff]   ;;  %v3310_v45 = vld [vmem:[#allocation12 + $0xe0] sm:$0xff]   ;;  %v3314_v51 = vld [vmem:[#allocation12 + $0xe8] sm:$0xff]   ;;  %vm4269_vm1 = vcmp.gt.s32.totalorder %v892_v48, 0  ;;  %v899_v57 = vand.u32 15, %v881_v50  ;;  %v906_v59 = vand.u32 15, %v882_v52  ;;  %p3548_p9 = pnand %p3547_p8, %p4877_p2 }
 0x406   : > { %2823 = vmatprep.subr.bf16.mxu0 %v3300_v33  ;;  %v3307_v41 = vld [vmem:[#allocation12 + $0x98] sm:$0xff]   ;;  %v3311_v46 = vld [vmem:[#allocation12 + $0xa0] sm:$0xff]   ;;  %v3315_v53 = vld [vmem:[#allocation12 + $0xa8] sm:$0xff]   ;;  %v4276_v0 = vadd.s32 32, %v4263_v43  ;;  %v913_v6 = vand.u32 15, %v883_v61  ;;  %s2766_s20 = sshll.u32 %s4873_s1, 3 }
 0x407   : > { %2862 = vmatpush3.bf16.msra.mxu1 %v3299_v32  ;;  %v3316_v54 = vld [vmem:[#allocation12 + $0x70] sm:$0xff]   ;;  %v3320_v62 = vld [vmem:[#allocation12 + $0x78] sm:$0xff]   ;;  %vm4278_vm3 = vcmp.lt.s32.totalorder %v899_v57, 15  ;;  %v4282_v3 = vld [vmem:[#allocation2] sm:$0xff]  ;;  %vm4284_vm4 = vcmp.gt.s32.totalorder %v906_v59, 0  ;;  %s2767_s7 = sshll.u32 %s4874_s25, 5  ;;  %s4876_s24 = smov %s4875_s27 }
 0x408   : > { %2863 = vmatprep.subr.bf16.mxu1 %v3302_v35  ;;  %v3317_v56 = vld [vmem:[#allocation12 + $0x30] sm:$0xff]   ;;  %v3321_v63 = vld [vmem:[#allocation12 + $0x38] sm:$0xff]   ;;  %v1001_v4 = vld [vmem:[#allocation2 + $0x8] sm:$0xff]  ;;  %v1008_v7 = vrot.slane %v4282_v3, 7  ;;  %v1093_v10 = vrot.slane %v4282_v3, 1  ;;  %v920_v16 = vand.u32 15, %v4276_v0  ;;  %s2444_s19 = sadd.s32 %s2767_s7, %s2766_s20  ;;  %p3549_p7 = pneg %p3548_p9 }
 0x409   : > { %2824 = vmatpush3.bf16.msra.mxu0 %v3301_v34  ;;  %v3318_v58 = vld [vmem:[#allocation12 + $0xf0] sm:$0xff]   ;;  %v3322_v1 = vld [vmem:[#allocation12 + $0xf8] sm:$0xff]   ;;  %v1009_v8 = vrot.slane %v1001_v4, 7  ;;  %v1085_v9 = vpack.c.bf16 %v1001_v4, %v4282_v3  ;;  %vm1045_vm5 = vmpackc.low %vm4269_vm1, %vm4269_vm1  ;;  %v1094_v12 = vrot.slane %v1001_v4, 1  ;;  %vm4337_vm11 = vcmp.lt.s32.totalorder %v913_v6, 15  ;;  %s2768_s23 = sshll.u32 %s2444_s19, 7 }
 0x40a   : > { %2825 = vmatprep.subr.bf16.mxu0 %v3304_v37  ;;  %v3319_v60 = vld [vmem:[#allocation12 + $0xb0] sm:$0xff]   ;;  %v3323_v11 = vld [vmem:[#allocation12 + $0xb8] sm:$0xff]   ;;  %vm1046_vm7 = vmpackc.low %vm3726_vm6, %vm3726_vm6  ;;  %v1053_v15 = vsel %vm1045_vm5, 65537, %v3727_v14  ;;  %v4342_v37 = vadd.s32 40, %v4263_v43  ;;  %vm4375_vm13 = vcmp.gt.s32.totalorder %v920_v16, 0  ;;  %s4627_s0 = scalar_lea.hbm %s4875_s27, %s2768_s23  ;;  %s3728_s26 = smov [#allocation15]  }
 0x40b   : > { %2864 = vmatpush3.bf16.msra.mxu1 %v3303_v36  ;;  %v4294_v13 = vld [vmem:[#allocation2 + $0x38] sm:$0xff]  ;;  %1965 = vmatprep.mubr.bf16.mxu0 %v1085_v9  ;;  %v1023_v18 = vsel %vm1016_vm15, %v1008_v7, %v1009_v8  ;;  %v4304_v19 = vsel %vm1046_vm7, 65537, %v3727_v14  ;;  %v3324_v20 = vld [vmem:[#allocation12 + $0x140] sm:$0xff]   ;;  %v1170_v21 = vld [vmem:[#allocation2 + $0x10] sm:$0xff]  ;;  %v1108_v27 = vsel %vm1101_vm2, %v1093_v10, %v1094_v12  ;;  %s3550_s28 = sshll.u32 %s3728_s26, 4  ;;  %s3551_s28 = int_to_ptr.vmem [resolvable:$false] %s3550_s28 }
 0x40c   : > { %2865 = vmatprep.subr.bf16.mxu1 %v3306_v40  ;;  %v4299_v17 = vrot.slane %v4294_v13, 7  ;;  %v2676_v22 = vcombine.low %v1053_v15, %v4304_v19  ;;  %v4307_v23 = vld [vmem:[#allocation2 + $0x18] sm:$0xff]  ;;  %v4309_v24 = vld [vmem:[#allocation2 + $0x48] sm:$0xff]  ;;  %v1178_v25 = vrot.slane %v1170_v21, 7  ;;  %v4311_v26 = vrot.slane %v1170_v21, 1  ;;  %v3325_v32 = vld [vmem:[#allocation12 + $0x100] sm:$0xff]   ;;  %p3553_p6 = scmp.lt.s32.totalorder %s4629_s2, %s3551_s28 }
 0x40d   : > { %2826 = vmatpush3.bf16.msra.mxu0 %v3305_v39  ;;  %v1179_v29 = vrot.slane %v4307_v23, 7  ;;  %v4322_v30 = vrot.slane %v4309_v24, 7  ;;  %v4325_v31 = vpack.c.bf16 %v4307_v23, %v1170_v21  ;;  %vm1131_vm8 = vmpackc.low %vm4278_vm3, %vm4278_vm3  ;;  %v3326_v35 = vld [vmem:[#allocation12 + $0x1c0] sm:$0xff]   ;;  %v3331_v55 = vld [vmem:[#allocation12 + $0x188] sm:$0xff]   ;;  %s3552_s6 = scalar_lea.vmem %s3551_s28, 2048 }
 0x40e   : > { %2827 = vmatprep.subr.bf16.mxu0 %v3308_v42  ;;  %v1024_v28 = vsel %vm1016_vm15, %v4299_v17, %v1008_v7  ;;  %vm4330_vm9 = vcmp.ne.s16.totalorder %v2676_v22, 0  ;;  %vm1047_vm10 = vmpackc.low %vm4284_vm4, %vm4284_vm4  ;;  %v1107_v40 = vsel %vm1101_vm2, %v1094_v12, %v4311_v26  ;;  %v3327_v42 = vld [vmem:[#allocation12 + $0x180] sm:$0xff]   ;;  %v1022_v48 = vsel %vm1016_vm15, %v1009_v8, %v1178_v25  ;;  %v3332_v59 = vld [vmem:[#allocation12 + $0x150] sm:$0xff]   ;;  %p3554_p13 = scmp.lt.s32.totalorder %s3552_s6, %s3546_s4 }
 0x40f   : > { %2866 = vmatpush3.bf16.msra.mxu1 %v3307_v41  ;;  %v1025_v33 = vpack.c.bf16 %v1023_v18, %v1024_v28  ;;  %v1192_v38 = vsel %vm1016_vm15, %v1178_v25, %v1179_v29  ;;  %v1193_v39 = vsel %vm1016_vm15, %v4322_v30, %v1178_v25  ;;  %v1139_v41 = vsel %vm1131_vm8, 65537, %v3727_v14  ;;  %v4383_v61 = vld [vmem:[#allocation2 + $0x28] sm:$0xff]  ;;  %vm1133_vm1 = vmpackc.low %vm4337_vm11, %vm4337_vm11  ;;  %v3333_v4 = vld [vmem:[#allocation12 + $0x110] sm:$0xff]  }
 0x410   : > { %2867 = vmatprep.subr.bf16.mxu1 %v3310_v45  ;;  %v1110_v45 = vpack.c.bf16 %v1107_v40, %v1108_v27  ;;  %v1141_v7 = vsel %vm1133_vm1, 65537, %v3727_v14  ;;  %v3334_v8 = vld [vmem:[#allocation12 + $0x1d0] sm:$0xff]   ;;  %v3337_v25 = vld [vmem:[#allocation12 + $0x118] sm:$0xff]   ;;  %v1098_v28 = vrot.slane %v4383_v61, 1  ;;  %vm1049_vm4 = vmpackc.low %vm4375_vm13, %vm4375_vm13  ;;  %p3555_p11 = por %p3554_p13, %p3553_p6 }
 0x411   : > { %2828 = vmatpush3.bf16.msra.mxu0 %v3309_v44  ;;  %v1194_v44 = vpack.c.bf16 %v1192_v38, %v1193_v39  ;;  %v2681_v12 = vcombine.low %v4304_v19, %v1141_v7  ;;  %v3335_v18 = vld [vmem:[#allocation12 + $0x190] sm:$0xff]   ;;  %v3338_v27 = vld [vmem:[#allocation12 + $0x1d8] sm:$0xff]   ;;  %v3340_v36 = vld [vmem:[#allocation12 + $0x160] sm:$0xff]  }
 0x412   : > { %2829 = vmatprep.subr.bf16.mxu0 %v3312_v47  ;;  %v3328_v47 = vld [vmem:[#allocation12 + $0x148] sm:$0xff]   ;;  %v3368_v22 = vld [vmem:[#allocation13 + $0x20] sm:$0xff]   ;;  %p3556_p0 = pnand %p3555_p11, %p3549_p7 }
 0x413   : > { %2868 = vmatpush3.bf16.msra.mxu1 %v3311_v46  ;;  %v2680_v46 = vcombine.low %v4304_v19, %v1139_v41  ;;  %2781 = vmatprep.mubr.msk.bf16.mxu1 %vm4330_vm9, %v1194_v44  ;;  %vm4422_vm3 = vcmp.ne.s16.totalorder %v2681_v12, 0  ;;  %v3341_v41 = vld [vmem:[#allocation12 + $0x120] sm:$0xff]   ;;  %v3344_v57 = vld [vmem:[#allocation12 + $0x168] sm:$0xff]  }
 0x414   : > { %2869 = vmatprep.subr.bf16.mxu1 %v3314_v51  ;;  %v3329_v51 = vld [vmem:[#allocation12 + $0x108] sm:$0xff]  }
 0x415   : > { %2830 = vmatpush3.bf16.msra.mxu0 %v3313_v49  ;;  %v1055_v49 = vsel %vm1047_vm10, 65537, %v3727_v14  ;;  %vm4367_vm12 = vcmp.ne.s16.totalorder %v2680_v46, 0  ;;  %v4453_v46 = vrot.slane %v4294_v13, 1  ;;  %v3365_v50 = vld [vmem:[#allocation13 + $0x8] sm:$0xff]  }
 0x416   : > { %2831 = vmatprep.subr.bf16.mxu0 %v3316_v54  ;;  %v2677_v52 = vcombine.low %v1055_v49, %v4304_v19  ;;  %v3330_v54 = vld [vmem:[#allocation12 + $0x1c8] sm:$0xff]  }
 0x417   : > { %2870 = vmatpush3.bf16.msra.mxu1 %v3315_v53  ;;  %v1215_v53 = vrot.slane %v4307_v23, 1  ;;  %v3336_v23 = vld [vmem:[#allocation12 + $0x158] sm:$0xff]  }
 0x418   : > { %2871 = vmatprep.subr.bf16.mxu1 %v3318_v58  ;;  %vm4379_vm14 = vcmp.ne.s16.totalorder %v2677_v52, 0  ;;  %v3342_v52 = vld [vmem:[#allocation12 + $0x1e0] sm:$0xff]  }
 0x419   : > { %2832 = vmatpush3.bf16.msra.mxu0 %v3317_v56  ;;  %v1026_v56 = vpack.c.bf16 %v1192_v38, %v1022_v48  ;;  %v1106_v6 = vsel %vm1101_vm2, %v4311_v26, %v1215_v53 }
 0x41a   : > { %2833 = vmatprep.subr.bf16.mxu0 %v3320_v62  ;;  %v927_v62 = vand.u32 15, %v4342_v37  ;;  %v1174_v37 = vld [vmem:[#allocation2 + $0x30] sm:$0xff] }
 0x41b   : > { %2872 = vmatpush3.bf16.msra.mxu1 %v3319_v60  ;;  %v1172_v60 = vld [vmem:[#allocation2 + $0x20] sm:$0xff]  ;;  %v1182_v40 = vrot.slane %v1174_v37, 7  ;;  %v1099_v44 = vrot.slane %v1174_v37, 1 }
 0x41c   : > { %2873 = vmatprep.subr.bf16.mxu1 %v3322_v1  ;;  %v4389_v0 = vrot.slane %v1172_v60, 7  ;;  %v1181_v1 = vrot.slane %v4383_v61, 7  ;;  %v4396_v2 = vpack.c.bf16 %v4383_v61, %v1172_v60  ;;  %v4398_v5 = vrot.slane %v1172_v60, 1  ;;  %v3345_v61 = vld [vmem:[#allocation12 + $0x128] sm:$0xff]  }
 0x41d   : > { %2834 = vmatpush3.bf16.msra.mxu0 %v3321_v63  ;;  %v4387_v63 = vadd.s32 48, %v4263_v43  ;;  %vm4436_vm5 = vcmp.lt.s32.totalorder %v927_v62, 15  ;;  %v1188_v48 = vsel %vm1016_vm15, %v1182_v40, %v4299_v17  ;;  %v3346_v62 = vld [vmem:[#allocation12 + $0x1e8] sm:$0xff]  }
 0x41e   : > { %2899 = vmatprep.subr.bf16.mxu0 %v3324_v20  ;;  %v4409_v9 = vsel %vm1016_vm15, %v4389_v0, %v1181_v1  ;;  %v1105_v16 = vsel %vm1101_vm2, %v1215_v53, %v4398_v5  ;;  %v887_v20 = vadd.s32 56, %v4263_v43  ;;  %vm1135_vm6 = vmpackc.low %vm4436_vm5, %vm4436_vm5  ;;  %v1189_v49 = vsel %vm1016_vm15, %v1181_v1, %v1182_v40  ;;  %v3343_v53 = vld [vmem:[#allocation12 + $0x1a0] sm:$0xff]   ;;  %v3366_v43 = vld [vmem:[#allocation13 + $0x10] sm:$0xff]  }
 0x41f   : > { %2874 = vmatpush3.bf16.msra.mxu1 %v3323_v11  ;;  %v1191_v11 = vsel %vm1016_vm15, %v1179_v29, %v4389_v0  ;;  %v4420_v21 = vpack.c.bf16 %v1105_v16, %v1106_v6  ;;  %v3339_v29 = vld [vmem:[#allocation12 + $0x198] sm:$0xff]   ;;  %v1109_v6 = vsel %vm1101_vm2, %v4453_v46, %v1093_v10  ;;  %v3349_v16 = vld [vmem:[#allocation12 + $0x130] sm:$0xff]   ;;  %v3369_v60 = vld [vmem:[#allocation13 + $0x28] sm:$0xff]  }
 0x420   : > { %2777 = vmatmul.mubr.msk.bf16.vlgmr.msra.gmra.mrb[0].mxu0 %vm4330_vm9, %v1025_v33  ;;  %2939 = vmatprep.subr.bf16.mxu1 %v3326_v35  ;;  %v1195_v15 = vpack.c.bf16 %v4409_v9, %v1191_v11  ;;  %v934_v33 = vand.u32 15, %v4387_v63  ;;  %v1057_v35 = vsel %vm1049_vm4, 65537, %v3727_v14  ;;  %v941_v38 = vand.u32 15, %v887_v20  ;;  %v3347_v63 = vld [vmem:[#allocation12 + $0x1a8] sm:$0xff]   ;;  %v4505_v11 = vld [vmem:[#allocation2 + $0x40] sm:$0xff] }
 0x421   : > { %2900 = vmatpush3.bf16.msra.mxu0 %v3325_v32  ;;  %1973 = vmatprep.mubr.bf16.mxu0 %v4325_v31  ;;  %v2678_v39 = vcombine.low %v1057_v35, %v4304_v19  ;;  %v3352_v32 = vld [vmem:[#allocation12 + $0x178] sm:$0xff]   ;;  %v3356_v35 = vld [vmem:[#allocation12 + $0x200] sm:$0xff]   ;;  %v1280_v34 = vpack.c.bf16 %v4309_v24, %v4505_v11 }
 0x422   : > { %2782 = vmatmul.mubr.msk.bf16.vlgmr.msra.gmra.mrb[0].mxu1 %vm4367_vm12, %v1110_v45  ;;  %2901 = vmatprep.subr.bf16.mxu0 %v3328_v47  ;;  %v1104_v45 = vsel %vm1101_vm2, %v4398_v5, %v1098_v28  ;;  %vm4475_vm8 = vcmp.gt.s32.totalorder %v934_v33, 0  ;;  %vm4492_vm13 = vcmp.lt.s32.totalorder %v941_v38, 15  ;;  %v3355_v33 = vld [vmem:[#allocation12 + $0x1b8] sm:$0xff]   ;;  %v3357_v38 = vld [vmem:[#allocation12 + $0x208] sm:$0xff]  }
 0x423   : > { %2940 = vmatpush3.bf16.msra.mxu1 %v3327_v42  ;;  %2783 = vmatprep.mubr.msk.bf16.mxu1 %vm4379_vm14, %v1195_v15  ;;  %v4444_v42 = vpack.c.bf16 %v4294_v13, %v1174_v37  ;;  %vm4455_vm7 = vcmp.ne.s16.totalorder %v2678_v39, 0  ;;  %v4467_v13 = vpack.c.bf16 %v1188_v48, %v1189_v49  ;;  %vm1051_vm11 = vmpackc.low %vm4475_vm8, %vm4475_vm8  ;;  %v1221_v48 = vrot.slane %v4309_v24, 1  ;;  %v3359_v49 = vld [vmem:[#allocation12 + $0x218] sm:$0xff]  }
 0x424   : > { %2941 = vmatprep.subr.bf16.mxu1 %v3330_v54  ;;  %v1103_v54 = vsel %vm1101_vm2, %v1098_v28, %v1099_v44  ;;  %v1059_v7 = vsel %vm1051_vm11, 65537, %v3727_v14  ;;  %vm1137_vm1 = vmpackc.low %vm4492_vm13, %vm4492_vm13 }
 0x425   : > { %2902 = vmatpush3.bf16.msra.mxu0 %v3329_v51  ;;  %v1143_v51 = vsel %vm1135_vm6, 65537, %v3727_v14  ;;  %v2679_v12 = vcombine.low %v1059_v7, %v4304_v19 }
 0x426   : > { %2903 = vmatprep.subr.bf16.mxu0 %v3332_v59  ;;  %v3362_v59 = vld [vmem:[#allocation12 + $0x230] sm:$0xff]  }
 0x427   : > { %2942 = vmatpush3.bf16.msra.mxu1 %v3331_v55  ;;  %v2682_v55 = vcombine.low %v4304_v19, %v1143_v51  ;;  %vm4512_vm4 = vcmp.ne.s16.totalorder %v2679_v12, 0 }
 0x428   : > { %2778 = vmatmul.mubr.msk.bf16.gmra.mrb[4].mxu0 %vm4379_vm14, %v1026_v56  ;;  %2943 = vmatprep.subr.bf16.mxu1 %v3334_v8  ;;  %v4472_v56 = vpack.c.bf16 %v1103_v54, %v1104_v45  ;;  %v3348_v8 = vld [vmem:[#allocation12 + $0x170] sm:$0xff]   ;;  %v1229_v54 = vsel %vm1101_vm2, %v1221_v48, %v4311_v26 }
 0x429   : > { %2904 = vmatpush3.bf16.msra.mxu0 %v3333_v4  ;;  %1981 = vmatprep.mubr.bf16.mxu0 %v4396_v2  ;;  %vm4482_vm10 = vcmp.ne.s16.totalorder %v2682_v55, 0  ;;  %v1102_v4 = vsel %vm1101_vm2, %v1099_v44, %v4453_v46  ;;  %v3358_v45 = vld [vmem:[#allocation12 + $0x210] sm:$0xff]  }
 0x42a   : > { %2784 = vmatmul.mubr.msk.bf16.gmra.mrb[4].mxu1 %vm4422_vm3, %v4420_v21  ;;  %2905 = vmatprep.subr.bf16.mxu0 %v3336_v23  ;;  %v1145_v23 = vsel %vm1137_vm1, 65537, %v3727_v14 }
 0x42b   : > { %2944 = vmatpush3.bf16.msra.mxu1 %v3335_v18  ;;  %2785 = vmatprep.mubr.msk.bf16.mxu1 %vm4455_vm7, %v4467_v13  ;;  %v1113_v18 = vpack.c.bf16 %v1109_v6, %v1102_v4 }
 0x42c   : > { %2945 = vmatprep.subr.bf16.mxu1 %v3338_v27  ;;  %v3351_v27 = vld [vmem:[#allocation12 + $0x1b0] sm:$0xff]  }
 0x42d   : > { %2906 = vmatpush3.bf16.msra.mxu0 %v3337_v25  ;;  %v3350_v25 = vld [vmem:[#allocation12 + $0x1f0] sm:$0xff]  }
 0x42e   : > { %2907 = vmatprep.subr.bf16.mxu0 %v3340_v36  ;;  %v1220_v36 = vrot.slane %v4505_v11, 1 }
 0x42f   : > { %2946 = vmatpush3.bf16.msra.mxu1 %v3339_v29  ;;  %v2683_v29 = vcombine.low %v4304_v19, %v1145_v23  ;;  %v3354_v19 = vld [vmem:[#allocation12 + $0x1f8] sm:$0xff]  }
 0x430   : > { %2779 = vmatmul.mubr.msk.bf16.gmra.mrb[8].mxu0 %vm4455_vm7, %v1195_v15  ;;  %2947 = vmatprep.subr.bf16.mxu1 %v3342_v52  ;;  %v1184_v15 = vrot.slane %v4505_v11, 7 }
 0x431   : > { %2908 = vmatpush3.bf16.msra.mxu0 %v3341_v41  ;;  %1989 = vmatprep.mubr.bf16.mxu0 %v4444_v42  ;;  %vm4535_vm5 = vcmp.ne.s16.totalorder %v2683_v29, 0 }
 0x432   : > { %2786 = vmatmul.mubr.msk.bf16.gmra.mrb[8].mxu1 %vm4482_vm10, %v4472_v56  ;;  %2909 = vmatprep.subr.bf16.mxu0 %v3344_v57  ;;  %v1186_v10 = vsel %vm1016_vm15, %v1184_v15, %v4322_v30  ;;  %v1187_v20 = vsel %vm1016_vm15, %v4299_v17, %v1184_v15  ;;  %v3353_v17 = vld [vmem:[#allocation12 + $0x138] sm:$0xff]  }
 0x433   : > { %2948 = vmatpush3.bf16.msra.mxu1 %v3343_v53  ;;  %v4526_v28 = vpack.c.bf16 %v1186_v10, %v1187_v20  ;;  %v1222_v53 = vsel %vm1101_vm2, %v1220_v36, %v1221_v48 }
 0x434   : > { %2949 = vmatprep.subr.bf16.mxu1 %v3346_v62  ;;  %v1233_v24 = vpack.c.bf16 %v1229_v54, %v1222_v53  ;;  %v3370_v62 = vld [vmem:[#allocation13 + $0x30] sm:$0xff]  }
 0x435   : > { %2910 = vmatpush3.bf16.msra.mxu0 %v3345_v61  ;;  %2787 = vmatprep.mubr.msk.bf16.mxu1 %vm4512_vm4, %v4526_v28 }
 0x436   : > { %2911 = vmatprep.subr.bf16.mxu0 %v3348_v8 }
 0x437   : > { %2950 = vmatpush3.bf16.msra.mxu1 %v3347_v63  ;;  %v3371_v63 = vld [vmem:[#allocation13 + $0x38] sm:$0xff]  }
 0x438   : > { %2780 = vmatmul.mubr.msk.bf16.gmra.mrb[12].mxu0 %vm4512_vm4, %v4467_v13  ;;  %2951 = vmatprep.subr.bf16.mxu1 %v3350_v25 }
 0x439   : > { %2912 = vmatpush3.bf16.msra.mxu0 %v3349_v16  ;;  %2789 = vmatprep.mubr.msk.bf16.mxu0 %vm4367_vm12, %v4420_v21  ;;  %v1249_v21 = vld [vmem:[#allocation2 + $0x58] sm:$0xff] }
 0x43a   : > { %2788 = vmatmul.mubr.msk.bf16.gmra.mrb[12].mxu1 %vm4535_vm5, %v1113_v18  ;;  %2913 = vmatprep.subr.bf16.mxu0 %v3352_v32  ;;  %v1257_v37 = vrot.slane %v1249_v21, 7  ;;  %v1293_v39 = vrot.slane %v1249_v21, 1 }
 0x43b   : > { %2952 = vmatpush3.bf16.msra.mxu1 %v3351_v27  ;;  %2160 = vmatprep.mubr.bf16.mxu1 %v4396_v2 }
 0x43c   : > { %2953 = vmatprep.subr.bf16.mxu1 %v3354_v19  ;;  %v1265_v40 = vsel %vm1016_vm15, %v1257_v37, %v4389_v0  ;;  %v1301_v44 = vsel %vm1101_vm2, %v1293_v39, %v4398_v5  ;;  %v1248_v0 = vld [vmem:[#allocation2 + $0x50] sm:$0xff] }
 0x43d   : > { %2914 = vmatpush3.bf16.msra.mxu0 %v3353_v17  ;;  %v1266_v41 = vpack.c.bf16 %v4409_v9, %v1265_v40  ;;  %v1292_v9 = vrot.slane %v1248_v0, 1  ;;  %v1256_v55 = vrot.slane %v1248_v0, 7  ;;  %v1281_v57 = vpack.c.bf16 %v1249_v21, %v1248_v0 }
 0x43e   : > { %3043 = vmatprep.subr.bf16.mxu0 %v3356_v35 }
 0x43f   : > { %2954 = vmatpush3.bf16.msra.mxu1 %v3355_v33  ;;  %v1294_v5 = vsel %vm1101_vm2, %v1292_v9, %v1293_v39  ;;  %v1258_v26 = vsel %vm1016_vm15, %v1256_v55, %v1257_v37  ;;  %v1259_v58 = vsel %vm1016_vm15, %v4322_v30, %v1256_v55  ;;  %v1295_v47 = vsel %vm1101_vm2, %v1221_v48, %v1292_v9  ;;  %v3364_v30 = vld [vmem:[#allocation13] sm:$0xff]  }
 0x440   : > { %2096 = vmatmul.mubr.bf16.vlgmr.msra.gmra.mrb[16].mxu0 %v4325_v31  ;;  %v1223_v31 = vsel %vm1101_vm2, %v4453_v46, %v1220_v36  ;;  %v1305_v52 = vpack.c.bf16 %v1301_v44, %v1294_v5  ;;  %v3360_v46 = vld [vmem:[#allocation12 + $0x220] sm:$0xff]   ;;  %v1304_v61 = vpack.c.bf16 %v1295_v47, %v1222_v53  ;;  %3067 = vmatprep.subr.bf16.mxu1 %v3364_v30 }
 0x441   : > { %3044 = vmatpush3.bf16.msra.mxu0 %v3356_v35  ;;  %2790 = vmatprep.mubr.msk.bf16.mxu0 %vm4422_vm3, %v4472_v56  ;;  %v1232_v51 = vpack.c.bf16 %v1223_v31, %v1102_v4  ;;  %v2684_v4 = vld [vmem:[%s4872_s9] ss:$0 sm:$0xff] }
 0x442   : > { %3045 = vmatprep.subr.bf16.mxu0 %v3357_v38  ;;  %2793 = vmatmul.mubr.msk.bf16.vlgmr.msra.gmra.mrb[16].mxu1 %vm4330_vm9, %v1266_v41 }
 0x443   : > { %2168 = vmatprep.mubr.bf16.mxu1 %v4444_v42  ;;  %3068 = vmatpush3.bf16.msra.mxu1 %v3364_v30 }
 0x444   : > { %3069 = vmatprep.subr.bf16.mxu1 %v3365_v50 }
 0x445   : > { %3046 = vmatpush3.bf16.msra.mxu0 %v3357_v38 }
 0x446   : > { %3047 = vmatprep.subr.bf16.mxu0 %v3358_v45 }
 0x447   : > { %3070 = vmatpush3.bf16.msra.mxu1 %v3365_v50 }
 0x448   : > { %2104 = vmatmul.mubr.bf16.gmra.mrb[20].mxu0 %v4396_v2  ;;  %v3361_v2 = vld [vmem:[#allocation12 + $0x228] sm:$0xff]   ;;  %3071 = vmatprep.subr.bf16.mxu1 %v3366_v43 }
 0x449   : > { %3048 = vmatpush3.bf16.msra.mxu0 %v3358_v45  ;;  %2791 = vmatprep.mubr.msk.bf16.mxu0 %vm4482_vm10, %v1232_v51 }
 0x44a   : > { %3049 = vmatprep.subr.bf16.mxu0 %v3359_v49  ;;  %2794 = vmatmul.mubr.msk.bf16.gmra.mrb[20].mxu1 %vm4379_vm14, %v4467_v13  ;;  %v1269_v13 = vpack.c.bf16 %v1258_v26, %v1259_v58 }
 0x44b   : > { %2176 = vmatprep.mubr.bf16.mxu1 %v1280_v34  ;;  %3072 = vmatpush3.bf16.msra.mxu1 %v3366_v43 }
 0x44d   : > { %3050 = vmatpush3.bf16.msra.mxu0 %v3359_v49 }
 0x44e   : > { %3051 = vmatprep.subr.bf16.mxu0 %v3360_v46 }
 0x450   : > { %2112 = vmatmul.mubr.bf16.gmra.mrb[24].mxu0 %v4444_v42  ;;  %v3363_v42 = vld [vmem:[#allocation12 + $0x238] sm:$0xff]  }
 0x451   : > { %3052 = vmatpush3.bf16.msra.mxu0 %v3360_v46  ;;  %2792 = vmatprep.mubr.msk.bf16.mxu0 %vm4535_vm5, %v1233_v24 }
 0x452   : > { %3053 = vmatprep.subr.bf16.mxu0 %v3361_v2  ;;  %2795 = vmatmul.mubr.msk.bf16.gmra.mrb[24].mxu1 %vm4455_vm7, %v4526_v28 }
 0x453   : > { %2184 = vmatprep.mubr.bf16.mxu1 %v1281_v57 }
 0x455   : > { %3054 = vmatpush3.bf16.msra.mxu0 %v3361_v2 }
 0x456   : > { %3055 = vmatprep.subr.bf16.mxu0 %v3362_v59 }
 0x458   : > { %2120 = vmatmul.mubr.bf16.gmra.mrb[28].mxu0 %v1280_v34 }
 0x459   : > { %3056 = vmatpush3.bf16.msra.mxu0 %v3362_v59  ;;  %3059 = vmatprep.mubr.msk.bf16.mxu0 %vm4367_vm12, %v4472_v56  ;;  %v3367_v56 = vld [vmem:[#allocation13 + $0x18] sm:$0xff]  }
 0x45a   : > { %3057 = vmatprep.subr.bf16.mxu0 %v3363_v42  ;;  %2796 = vmatmul.mubr.msk.bf16.gmra.mrb[28].mxu1 %vm4512_vm4, %v1269_v13 }
 0x45b   : > { %3073 = vmatprep.subr.bf16.mxu1 %v3367_v56 }
 0x45c   : > { %3074 = vmatpush3.bf16.msra.mxu1 %v3367_v56 }
 0x45d   : > { %3058 = vmatpush3.bf16.msra.mxu0 %v3363_v42  ;;  %3075 = vmatprep.subr.bf16.mxu1 %v3368_v22 }
 0x460   : > { %3060 = vmatmul.mubr.msk.bf16.vlgmr.msra.gmra.mrb[32].mxu0 %vm4422_vm3, %v1232_v51  ;;  %3076 = vmatpush3.bf16.msra.mxu1 %v3368_v22 }
 0x461   : > { %3063 = vmatprep.mubr.msk.bf16.mxu0 %vm4482_vm10, %v1304_v61  ;;  %3077 = vmatprep.subr.bf16.mxu1 %v3369_v60 }
 0x464   : > { %3078 = vmatpush3.bf16.msra.mxu1 %v3369_v60 }
 0x465   : > { %3079 = vmatprep.subr.bf16.mxu1 %v3370_v62 }
 0x468   : > { %3064 = vmatmul.mubr.msk.bf16.gmra.mrb[36].mxu0 %vm4535_vm5, %v1305_v52  ;;  %3080 = vmatpush3.bf16.msra.mxu1 %v3370_v62 }
 0x469   : > { %3081 = vmatprep.subr.bf16.mxu1 %v3371_v63 }
 0x46c   : > { %3082 = vmatpush3.bf16.msra.mxu1 %v3371_v63 }
 0x4f3   : > { %v2835_v1 = vpop.f32.mrb[0].mxu0 }
 0x4f4   : > { %v2836_v6 = vpop.f32.mrb[1].mxu0 }
 0x4f5   : > { %v2837_v7 = vadd.f32 %v2836_v6, %v2835_v1  ;;  %v2838_v8 = vpop.f32.mrb[2].mxu0  ;;  %v2875_v11 = vpop.f32.mrb[0].mxu1 }
 0x4f6   : > { %v2839_v12 = vpop.f32.mrb[3].mxu0  ;;  %v2876_v18 = vpop.f32.mrb[1].mxu1 }
 0x4f7   : > { %v1968_v15 = vadd.f32 %v2837_v7, %v2684_v4  ;;  %v2840_v16 = vadd.f32 %v2839_v12, %v2838_v8  ;;  %v2877_v3 = vadd.f32 %v2876_v18, %v2875_v11  ;;  %v2878_v10 = vpop.f32.mrb[2].mxu1 }
 0x4f8   : > { %v2879_v23 = vpop.f32.mrb[3].mxu1 }
 0x4f9   : > { %v1971_v20 = vadd.f32 %v2840_v16, %v2684_v4  ;;  %v2033_v25 = vadd.f32 %v2877_v3, %v1968_v15  ;;  %v2880_v27 = vadd.f32 %v2879_v23, %v2878_v10 }
 0x4fb   : > { %v2841_v28 = vpop.f32.mrb[4].mxu0  ;;  %v2036_v29 = vadd.f32 %v2880_v27, %v1971_v20 }
 0x4fc   : > { %v2842_v32 = vpop.f32.mrb[5].mxu0 }
 0x4fd   : > { %v2843_v14 = vadd.f32 %v2842_v32, %v2841_v28  ;;  %v2844_v17 = vpop.f32.mrb[6].mxu0  ;;  %v2881_v35 = vpop.f32.mrb[4].mxu1 }
 0x4fe   : > { %v2845_v19 = vpop.f32.mrb[7].mxu0  ;;  %v2882_v36 = vpop.f32.mrb[5].mxu1 }
 0x4ff   : > { %v1976_v33 = vadd.f32 %v2843_v14, %v2684_v4  ;;  %v2846_v21 = vadd.f32 %v2845_v19, %v2844_v17  ;;  %v2883_v38 = vadd.f32 %v2882_v36, %v2881_v35  ;;  %v2884_v39 = vpop.f32.mrb[6].mxu1 }
 0x500   : > { %v2885_v40 = vpop.f32.mrb[7].mxu1 }
 0x501   : > { %v1979_v37 = vadd.f32 %v2846_v21, %v2684_v4  ;;  %v2041_v41 = vadd.f32 %v2883_v38, %v1976_v33  ;;  %v2886_v44 = vadd.f32 %v2885_v40, %v2884_v39 }
 0x503   : > { %v2044_v45 = vadd.f32 %v2886_v44, %v1979_v37  ;;  %v2847_v31 = vpop.f32.mrb[8].mxu0 }
 0x504   : > { %v2848_v0 = vpop.f32.mrb[9].mxu0 }
 0x505   : > { %v2849_v9 = vadd.f32 %v2848_v0, %v2847_v31  ;;  %v2850_v48 = vpop.f32.mrb[10].mxu0  ;;  %v2887_v49 = vpop.f32.mrb[8].mxu1 }
 0x506   : > { %v2851_v51 = vpop.f32.mrb[11].mxu0  ;;  %v2888_v34 = vpop.f32.mrb[9].mxu1 }
 0x507   : > { %v1984_v5 = vadd.f32 %v2849_v9, %v2684_v4  ;;  %v2852_v52 = vadd.f32 %v2851_v51, %v2850_v48  ;;  %v2889_v46 = vadd.f32 %v2888_v34, %v2887_v49  ;;  %v2890_v53 = vpop.f32.mrb[10].mxu1 }
 0x508   : > { %v2891_v24 = vpop.f32.mrb[11].mxu1 }
 0x509   : > { %v1987_v54 = vadd.f32 %v2852_v52, %v2684_v4  ;;  %v2049_v2 = vadd.f32 %v2889_v46, %v1984_v5  ;;  %v2892_v55 = vadd.f32 %v2891_v24, %v2890_v53 }
 0x50b   : > { %v2052_v57 = vadd.f32 %v2892_v55, %v1987_v54  ;;  %v2853_v59 = vpop.f32.mrb[12].mxu0 }
 0x50c   : > { %v2854_v26 = vpop.f32.mrb[13].mxu0 }
 0x50d   : > { %v2855_v58 = vadd.f32 %v2854_v26, %v2853_v59  ;;  %v2856_v42 = vpop.f32.mrb[14].mxu0  ;;  %v2893_v13 = vpop.f32.mrb[12].mxu1 }
 0x50e   : > { %v2857_v47 = vpop.f32.mrb[15].mxu0  ;;  %v2894_v50 = vpop.f32.mrb[13].mxu1 }
 0x50f   : > { %v1992_v61 = vadd.f32 %v2855_v58, %v2684_v4  ;;  %v2858_v30 = vadd.f32 %v2857_v47, %v2856_v42  ;;  %v2895_v43 = vadd.f32 %v2894_v50, %v2893_v13  ;;  %v2896_v56 = vpop.f32.mrb[14].mxu1 }
 0x510   : > { %v2897_v60 = vpop.f32.mrb[15].mxu1 }
 0x511   : > { %v1995_v22 = vadd.f32 %v2858_v30, %v2684_v4  ;;  %v2057_v62 = vadd.f32 %v2895_v43, %v1992_v61  ;;  %v2898_v63 = vadd.f32 %v2897_v60, %v2896_v56 }
 0x513   : > { %v2915_v1 = vpop.f32.mrb[16].mxu0  ;;  %v2060_v6 = vadd.f32 %v2898_v63, %v1995_v22 }
 0x514   : > { %v2916_v7 = vpop.f32.mrb[17].mxu0 }
 0x515   : > { %v2917_v8 = vadd.f32 %v2916_v7, %v2915_v1  ;;  %v2918_v11 = vpop.f32.mrb[18].mxu0  ;;  %v2955_v12 = vpop.f32.mrb[16].mxu1 }
 0x516   : > { %v2919_v15 = vpop.f32.mrb[19].mxu0  ;;  %v2956_v3 = vpop.f32.mrb[17].mxu1 }
 0x517   : > { %v2098_v16 = vadd.f32 %v2917_v8, %v2033_v25  ;;  %v2920_v18 = vadd.f32 %v2919_v15, %v2918_v11  ;;  %v2957_v10 = vadd.f32 %v2956_v3, %v2955_v12  ;;  %v2958_v20 = vpop.f32.mrb[18].mxu1 }
 0x518   : > { %v2959_v27 = vpop.f32.mrb[19].mxu1 }
 0x519   : > { %v2101_v23 = vadd.f32 %v2920_v18, %v2036_v29  ;;  %v2960_v28 = vadd.f32 %v2959_v27, %v2958_v20  ;;  %v2163_v32 = vadd.f32 %v2957_v10, %v2098_v16 }
 0x51b   : > { %v2921_v4 = vpop.f32.mrb[20].mxu0  ;;  %v2166_v17 = vadd.f32 %v2960_v28, %v2101_v23 }
 0x51c   : > { %v2922_v14 = vpop.f32.mrb[21].mxu0 }
 0x51d   : > { %v2923_v19 = vadd.f32 %v2922_v14, %v2921_v4  ;;  %v2924_v33 = vpop.f32.mrb[22].mxu0  ;;  %v2961_v35 = vpop.f32.mrb[20].mxu1 }
 0x51e   : > { %v2925_v21 = vpop.f32.mrb[23].mxu0  ;;  %v2962_v38 = vpop.f32.mrb[21].mxu1 }
 0x51f   : > { %v2106_v36 = vadd.f32 %v2923_v19, %v2041_v41  ;;  %v2926_v37 = vadd.f32 %v2925_v21, %v2924_v33  ;;  %v2963_v39 = vadd.f32 %v2962_v38, %v2961_v35  ;;  %v2964_v25 = vpop.f32.mrb[22].mxu1 }
 0x520   : > { %v2965_v44 = vpop.f32.mrb[23].mxu1 }
 0x521   : > { %v2109_v40 = vadd.f32 %v2926_v37, %v2044_v45  ;;  %v2966_v31 = vadd.f32 %v2965_v44, %v2964_v25  ;;  %v2171_v0 = vadd.f32 %v2963_v39, %v2106_v36 }
 0x523   : > { %v2927_v29 = vpop.f32.mrb[24].mxu0  ;;  %v2174_v48 = vadd.f32 %v2966_v31, %v2109_v40 }
 0x524   : > { %v2928_v9 = vpop.f32.mrb[25].mxu0 }
 0x525   : > { %v2929_v49 = vadd.f32 %v2928_v9, %v2927_v29  ;;  %v2930_v51 = vpop.f32.mrb[26].mxu0  ;;  %v2967_v5 = vpop.f32.mrb[24].mxu1 }
 0x526   : > { %v2931_v52 = vpop.f32.mrb[27].mxu0  ;;  %v2968_v53 = vpop.f32.mrb[25].mxu1 }
 0x527   : > { %v2114_v34 = vadd.f32 %v2929_v49, %v2049_v2  ;;  %v2932_v46 = vadd.f32 %v2931_v52, %v2930_v51  ;;  %v2969_v54 = vadd.f32 %v2968_v53, %v2967_v5  ;;  %v2970_v41 = vpop.f32.mrb[26].mxu1  ;;  %v2304_v5 = vld [vmem:[%s4193_s5 + $0x10] sm:$0xff]  ;;  %v2302_v52 = vld [vmem:[%s4193_s5] sm:$0xff] }
 0x528   : > { %v2971_v55 = vpop.f32.mrb[27].mxu1 }
 0x529   : > { %v2117_v24 = vadd.f32 %v2932_v46, %v2052_v57  ;;  %v2972_v59 = vadd.f32 %v2971_v55, %v2970_v41  ;;  %v2179_v26 = vadd.f32 %v2969_v54, %v2114_v34  ;;  %v2305_v46 = vld [vmem:[%s4193_s5 + $0x18] sm:$0xff]  ;;  %v2303_v41 = vld [vmem:[%s4193_s5 + $0x8] sm:$0xff] }
 0x52b   : > { %v2933_v45 = vpop.f32.mrb[28].mxu0  ;;  %v2182_v42 = vadd.f32 %v2972_v59, %v2117_v24 }
 0x52c   : > { %v2934_v58 = vpop.f32.mrb[29].mxu0 }
 0x52d   : > { %v2935_v13 = vadd.f32 %v2934_v58, %v2933_v45  ;;  %v2936_v47 = vpop.f32.mrb[30].mxu0  ;;  %v2973_v61 = vpop.f32.mrb[28].mxu1  ;;  %v2308_v58 = vld [vmem:[%s4193_s5 + $0x30] sm:$0xff] }
 0x52e   : > { %v2937_v30 = vpop.f32.mrb[31].mxu0  ;;  %v2974_v56 = vpop.f32.mrb[29].mxu1 }
 0x52f   : > { %v2122_v50 = vadd.f32 %v2935_v13, %v2057_v62  ;;  %v2938_v43 = vadd.f32 %v2937_v30, %v2936_v47  ;;  %v2975_v22 = vadd.f32 %v2974_v56, %v2973_v61  ;;  %v2976_v2 = vpop.f32.mrb[30].mxu1  ;;  %v2309_v47 = vld [vmem:[%s4193_s5 + $0x38] sm:$0xff] }
 0x530   : > { %v2977_v63 = vpop.f32.mrb[31].mxu1 }
 0x531   : > { %v2125_v60 = vadd.f32 %v2938_v43, %v2060_v6  ;;  %v2978_v1 = vadd.f32 %v2977_v63, %v2976_v2  ;;  %v2187_v7 = vadd.f32 %v2975_v22, %v2122_v50  ;;  %v2307_v50 = vld [vmem:[%s4193_s5 + $0x28] sm:$0xff] }
 0x533   : > { %v3061_v57 = vpop.f32.mrb[32].mxu0  ;;  %v2190_v12 = vadd.f32 %v2978_v1, %v2125_v60 }
 0x534   : > { %v2236_v8 = vadd.f32 %v3061_v57, %v2171_v0  ;;  %v2227_v11 = vpop.f32.mrb[33].mxu0 }
 0x535   : > { %v2228_v15 = vadd.f32 %v2227_v11, %v2163_v32  ;;  %v3062_v16 = vpop.f32.mrb[34].mxu0 }
 0x536   : > { %v2268_v18 = vmul.f32 0.01, %v2236_v8  ;;  %v2239_v3 = vadd.f32 %v3062_v16, %v2174_v48  ;;  %v2230_v10 = vpop.f32.mrb[35].mxu0  ;;  %vm2260_vm15 = vcmp.ge.f32.partialorder %v2236_v8, 0.0 }
 0x537   : > { %v2266_v20 = vmul.f32 0.01, %v2228_v15  ;;  %v2231_v62 = vadd.f32 %v2230_v10, %v2166_v17  ;;  %vm2258_vm2 = vcmp.ge.f32.partialorder %v2228_v15, 0.0 }
 0x538   : > { %vm2261_vm9 = vcmp.ge.f32.partialorder %v2239_v3, 0.0  ;;  %v2269_v23 = vmul.f32 0.01, %v2239_v3  ;;  %v2276_v27 = vsel %vm2260_vm15, %v2236_v8, %v2268_v18 }
 0x539   : > { %vm2259_vm12 = vcmp.ge.f32.partialorder %v2231_v62, 0.0  ;;  %v2267_v6 = vmul.f32 0.01, %v2231_v62  ;;  %v2274_v19 = vsel %vm2258_vm2, %v2228_v15, %v2266_v20 }
 0x53a   : > { %v2277_v28 = vsel %vm2261_vm9, %v2239_v3, %v2269_v23 }
 0x53b   : > { %v2283_v4 = vpack.c.bf16 %v2277_v28, %v2276_v27  ;;  %v3065_v14 = vpop.f32.mrb[36].mxu0  ;;  %v2275_v33 = vsel %vm2259_vm12, %v2231_v62, %v2267_v6 }
 0x53c   : > { %v2252_v35 = vadd.f32 %v3065_v14, %v2187_v7  ;;  %v2243_v32 = vpop.f32.mrb[37].mxu0  ;;  %v2282_v21 = vpack.c.bf16 %v2275_v33, %v2274_v19 }
 0x53d   : > { %v2244_v36 = vadd.f32 %v2243_v32, %v2179_v26  ;;  %v3066_v37 = vpop.f32.mrb[38].mxu0 }
 0x53e   : > { %v2272_v38 = vmul.f32 0.01, %v2252_v35  ;;  %v2255_v39 = vadd.f32 %v3066_v37, %v2190_v12  ;;  %v2246_v25 = vpop.f32.mrb[39].mxu0  ;;  %3083 = vmatprep.mubr.bf16.mxu1 %v2282_v21  ;;  %vm2264_vm14 = vcmp.ge.f32.partialorder %v2252_v35, 0.0 }
 0x53f   : > { %v2270_v17 = vmul.f32 0.01, %v2244_v36  ;;  %v2247_v40 = vadd.f32 %v2246_v25, %v2182_v42  ;;  %3084 = vmatmul.mubr.bf16.vlgmr.msra.gmra.mrb[32].mxu1 %v2283_v4  ;;  %vm2262_vm3 = vcmp.ge.f32.partialorder %v2244_v36, 0.0  ;;  %v2306_v42 = vld [vmem:[%s4193_s5 + $0x20] sm:$0xff]  ;;  %s2432_s5 = scalar_lea.sflag [#allocation6], %s4187_s14 }
 0x540   : > { %vm2265_vm6 = vcmp.ge.f32.partialorder %v2255_v39, 0.0  ;;  %v2273_v44 = vmul.f32 0.01, %v2255_v39  ;;  %v2280_v0 = vsel %vm2264_vm14, %v2252_v35, %v2272_v38 }
 0x541   : > { %vm2263_vm7 = vcmp.ge.f32.partialorder %v2247_v40, 0.0  ;;  %v2271_v31 = vmul.f32 0.01, %v2247_v40  ;;  %v2278_v9 = vsel %vm2262_vm3, %v2244_v36, %v2270_v17 }
 0x542   : > { %v2281_v29 = vsel %vm2265_vm6, %v2255_v39, %v2273_v44 }
 0x543   : > { %v2279_v48 = vsel %vm2263_vm7, %v2247_v40, %v2271_v31  ;;  %v2285_v49 = vpack.c.bf16 %v2281_v29, %v2280_v0 }
 0x544   : > { %v2284_v51 = vpack.c.bf16 %v2279_v48, %v2278_v9 }
 0x546   : > { %3087 = vmatprep.mubr.bf16.mxu1 %v2284_v51 }
 0x547   : > { %3088 = vmatmul.mubr.bf16.gmra.mrb[36].mxu1 %v2285_v49 }
 0x612   : > { %v3085_v34 = vpop.f32.mrb[32].mxu1 }
 0x613   : > { %v2401_v53 = vadd.f32 %v3085_v34, %v2304_v5  ;;  %v2392_v54 = vpop.f32.mrb[33].mxu1 }
 0x614   : > { %v2393_v24 = vadd.f32 %v2392_v54, %v2302_v52  ;;  %v3086_v55 = vpop.f32.mrb[34].mxu1 }
 0x615   : > { %2425 = vst.msk [vmem:[%s4241_s15 + $0x10] sm:$0xff] %vm561_vm0, %v2401_v53  ;;  %v2404_v59 = vadd.f32 %v3086_v55, %v2305_v46  ;;  %v2395_v26 = vpop.f32.mrb[35].mxu1 }
 0x616   : > { %2423 = vst.msk [vmem:[%s4241_s15] sm:$0xff] %vm561_vm0, %v2393_v24  ;;  %v2396_v45 = vadd.f32 %v2395_v26, %v2303_v41 }
 0x617   : > { %2426 = vst.msk [vmem:[%s4241_s15 + $0x18] sm:$0xff] %vm561_vm0, %v2404_v59 }
 0x618   : > { %2424 = vst.msk [vmem:[%s4241_s15 + $0x8] sm:$0xff] %vm561_vm0, %v2396_v45 }
 0x61a   : > { %v3089_v13 = vpop.f32.mrb[36].mxu1 }
 0x61b   : > { %v2417_v61 = vadd.f32 %v3089_v13, %v2308_v58  ;;  %v2408_v30 = vpop.f32.mrb[37].mxu1 }
 0x61c   : > { %v2409_v43 = vadd.f32 %v2408_v30, %v2306_v42  ;;  %v3090_v56 = vpop.f32.mrb[38].mxu1 }
 0x61d   : > { %2429 = vst.msk [vmem:[%s4241_s15 + $0x30] sm:$0xff] %vm561_vm0, %v2417_v61  ;;  %v2420_v22 = vadd.f32 %v3090_v56, %v2309_v47  ;;  %v2411_v2 = vpop.f32.mrb[39].mxu1 }
 0x61e   : > { %2427 = vst.msk [vmem:[%s4241_s15 + $0x20] sm:$0xff] %vm561_vm0, %v2409_v43  ;;  %v2412_v60 = vadd.f32 %v2411_v2, %v2307_v50 }
 0x61f   : > { %2430 = vst.msk [vmem:[%s4241_s15 + $0x38] sm:$0xff] %vm561_vm0, %v2420_v22 }
 0x620   : > { %2428 = vst.msk [vmem:[%s4241_s15 + $0x28] sm:$0xff] %vm561_vm0, %v2412_v60 }
 0x621   : > { %3559 = shalt.err (!%p3556_p0)
}
 0x622   : > { %s3560_s15 = scalar_lea.hbm %s4627_s0, 1024  ;;  %s3564_s9 = scalar_lea.hbm %s4876_s24, 8192 }
 0x623   : > { %p3561_p1 = scmp.ne.s32.totalorder %s4627_s0, %s3560_s15  ;;  %p3565_p4 = scmp.lt.u32.totalorder %s4627_s0, %s4876_s24 }
 0x624   : > { %p3566_p5 = scmp.lt.u32.totalorder %s3564_s9, %s3560_s15  ;;  %p3568_p8 = scmp.lt.u32.totalorder %s3560_s15, %s4627_s0 }
 0x625   : > { %p3562_p3 = pnand %p3561_p1, %p4877_p2 }
 0x626   : > { %p3567_p10 = por %p3566_p5, %p3565_p4 }
 0x627   : > { %p3563_p12 = pneg %p3562_p3 }
 0x628   : > { %p3569_p9 = por %p3568_p8, %p3567_p10 }
 0x62a   : > { %p3570_p7 = pnand %p3569_p9, %p3563_p12 }
 0x62c   : > { %3573 = shalt.err (!%p3570_p7)
}
 0x62d   : > { %s3729_s20 = smov 128   ;;  %s3730_s7 = smov 8  }
 0x62e   : > { %3117 = dma.vmem_to_hbm [thread:$0]  (%p4877_p2), %s4629_s2, 1024, %s4627_s0, %s2432_s5, %s3729_s20, %s3729_s20, %s3730_s7  }
 0x62f PF: > { %s4878_s19 = sld [smem:[#allocation37_spill]]  ;;  %p3150_p6 = scmp.ge.s32.totalorder %s3708_s18, 2 }
 0x630   : > { %s2462_s23 = sand.u32 1, %s3680_s11  }
 0x631   : > { %s2463_s3 = scalar_lea.sflag [#allocation6], %s2462_s23 }
 0x635   : > { %p4879_p13 = scmp.ne.s32.totalorder %s4878_s19, 0 }
 0x637   : > { %p3140_p11 = pnand %p3150_p6, %p4879_p13 }
 0x639   : > { %3651 = dma.done.wait (!%p3140_p11), %s2463_s3, 1024  }
 0x63a   : > { %3653 = vsyncadd (!%p3140_p11), %s2463_s3, 4294966272  ;;  %s29_s18 = sadd.s32 1, %s3708_s18   ;;  %s4881_s27 = sld [smem:[#allocation23_spill]] }
 0x63b   : > { %p4666_p0 = scmp.ge.s32.totalorder %s29_s18, 10   ;;  %s4882_s28 = sld [smem:[#allocation24_spill]] }
 0x63c   : > { %s4883_s22 = sld [smem:[#allocation25_spill]]  ;;  %s4884_s14 = smov %s3938_s30 }
 0x63d   : > { %s4885_s2 = sld [smem:[#allocation36_spill]]  ;;  %s4886_s0 = sld [smem:[#allocation28_spill]] }
 0x63e   : > { %s4887_s15 = sld [smem:[#allocation29_spill]]  ;;  %s4888_s16 = sld [smem:[#allocation31_spill]] }
 0x63f   : > { %s4889_s17 = sld [smem:[#allocation32_spill]]  ;;  %s4891_s9 = smov %s3676_s10 }
 0x640   : > { %s4892_s10 = smov %s4884_s14  ;;  %s4893_s11 = smov %s3684_s12 }
 0x641   : > { %s4894_s12 = smov %s3688_s13  ;;  %28 = sbr.rel (!%p4666_p0) target bundleno = 24 (0x18), region = 149 }
 0x642   : > { %s4890_s30 = smov %s4883_s22 }
 0x643   : > { %s4895_s13 = smov %s4885_s2  ;;  %s4896_s14 = smov %s4886_s0 }
 0x648   :  { %2468 = vsyncpa [#allocation5], 1 }
 0x649   :  { %2470 = vsyncpa [#allocation5 + $0x1], 1 }
 0x64a   :  { %2471 = vsyncpa [#allocation8], 1 }
 0x64b   :  { %2473 = vsyncpa [#allocation8 + $0x1], 1 }
 0x64c   :  { %2474 = vsyncpa [#allocation11], 1 }
 0x64d   :  { %2475 = vsyncpa [#allocation14], 1 }
 0x64e   :  { %2476 = vsyncpa [#allocation6], 1 }
 0x64f   :  { %2478 = vsyncpa [#allocation6 + $0x1], 1 }

</bundles_post_ra>
